<compile_context>
chip_gen: v5e
topology: v5e:2x2
jax: 0.10.0
libtpu: 0.0.40
codegen_flags: <defaults>
</compile_context>

<pallas_src>
import numpy as np

import jax
import jax.numpy as jnp
from jax.experimental import pallas as pl
from jax.experimental.pallas import tpu as pltpu

EPSILON = 0.0001

# Pixels per lane-row (output lane width).  Input lane width is 4*TC = 256.
# TC=64 keeps the 6-pass f32 selection matmuls under the HBM roofline on
# v5e/v6e/v7x while keeping every DMA fully contiguous.
TC = 64


def _smooth_l1_kernel(net_ref, gt_ref, w_ref, ssum_ref, sdx_ref, sdy_ref, out_ref):
    # net_ref, gt_ref : (BR, 4*TC)  channel-interleaved pixels (pixel-major)
    # w_ref, out_ref  : (BR, TC)    one value per pixel
    # ssum/sdx/sdy    : (4*TC, TC)  constant 0/+-1 selection matrices
    net = net_ref[...]
    gtv = gt_ref[...]

    # elementwise smooth-L1 pieces (incl. the unconditional -0.5 per channel)
    d = net - gtv
    ad = jnp.abs(d)
    pw = jnp.where(ad < 1.0, 0.5 * ad * ad, ad) - 0.5            # (BR, 4*TC)

    hi = jax.lax.Precision.HIGHEST  # keep the +-1/0 picks f32-exact on the MXU
    # per-pixel channel sum:   s[i, p]  = sum_c pw[i, 4p+c]
    s = jnp.dot(pw, ssum_ref[...], precision=hi,
                preferred_element_type=jnp.float32)              # (BR, TC)
    # quad_norm picks:         dx = c0-c2,  dy = c1-c3
    dx = jnp.dot(gtv, sdx_ref[...], precision=hi,
                 preferred_element_type=jnp.float32)             # (BR, TC)
    dy = jnp.dot(gtv, sdy_ref[...], precision=hi,
                 preferred_element_type=jnp.float32)             # (BR, TC)

    n_q = jnp.sqrt(dx * dx + dy * dy) * 4.0 + EPSILON
    out_ref[...] = s / n_q * w_ref[...]


def _selection_matrices(tc):
    l = np.arange(4 * tc)[:, None]          # interleaved lane index
    p = np.arange(tc)[None, :]              # pixel index within the row
    s_sum = (l // 4 == p).astype(np.float32)
    s_dx = (l == 4 * p).astype(np.float32) - (l == 4 * p + 2).astype(np.float32)
    s_dy = (l == 4 * p + 1).astype(np.float32) - (l == 4 * p + 3).astype(np.float32)
    return jnp.asarray(s_sum), jnp.asarray(s_dx), jnp.asarray(s_dy)


def _cdiv(a, b):
    return -(-a // b)


def smooth_l1_loss(netout, gt, weights, *, max_block_rows=1024):
    """netout, gt: (B, H, W, 4); weights: (B, H, W). Returns (B, H, W) loss."""
    B, H, W, C = gt.shape
    assert C == 4, "quad geometry expects last dim == 4"
    N = B * H * W
    tc = TC

    # rows of TC pixels each; block rows chosen so each grid step moves a few
    # MB (amortizes per-step overhead) and large inputs get >= 2 grid steps
    # so both v7x TensorCores are used.
    r0 = _cdiv(N, tc)
    br = max(8, min(max_block_rows, 8 * _cdiv(_cdiv(r0, 2), 8)))
    R = br * _cdiv(r0, br)
    Np = R * tc

    net_flat = netout.astype(jnp.float32).reshape(-1)
    gt_flat = gt.astype(jnp.float32).reshape(-1)
    w_flat = weights.astype(jnp.float32).reshape(-1)
    if Np != N:  # pad only when the shape doesn't divide the tile
        net_flat = jnp.pad(net_flat, (0, (Np - N) * 4))
        gt_flat = jnp.pad(gt_flat, (0, (Np - N) * 4))
        w_flat = jnp.pad(w_flat, (0, Np - N))

    # pure reshapes (no data movement): channel-interleaved rows of 4*TC lanes
    net2 = net_flat.reshape(R, 4 * tc)
    gt2 = gt_flat.reshape(R, 4 * tc)
    w2 = w_flat.reshape(R, tc)
    s_sum, s_dx, s_dy = _selection_matrices(tc)

    out = pl.pallas_call(
        _smooth_l1_kernel,
        out_shape=jax.ShapeDtypeStruct((R, tc), jnp.float32),
        grid_spec=pltpu.PrefetchScalarGridSpec(
            num_scalar_prefetch=0,
            grid=(R // br,),
            in_specs=[
                pl.BlockSpec((br, 4 * tc), lambda i: (i, 0)),
                pl.BlockSpec((br, 4 * tc), lambda i: (i, 0)),
                pl.BlockSpec((br, tc), lambda i: (i, 0)),
                # constant selection matrices: fetched once, stay resident
                pl.BlockSpec((4 * tc, tc), lambda i: (0, 0)),
                pl.BlockSpec((4 * tc, tc), lambda i: (0, 0)),
                pl.BlockSpec((4 * tc, tc), lambda i: (0, 0)),
            ],
            out_specs=pl.BlockSpec((br, tc), lambda i: (i, 0)),
        ),
        compiler_params=pltpu.CompilerParams(
            dimension_semantics=("parallel",),
        ),
    )(net2, gt2, w2, s_sum, s_dx, s_dy)

    out_flat = out.reshape(-1)
    if Np != N:
        out_flat = out_flat[:N]
    return out_flat.reshape(B, H, W)


def _reference(netout, gt, weights):
    # pure-JAX reference mirroring the PyTorch module
    dxy = gt.reshape(-1, 2, 2)
    d = dxy[:, 0:1, :] - dxy[:, 1:2, :]
    dist = jnp.sqrt(jnp.sum(jnp.square(d), axis=-1)) * 4.0 + EPSILON
    n_q = dist.reshape(weights.shape)
    diff = netout - gt
    ad = jnp.abs(diff)
    mask = (ad < 1.0).astype(jnp.float32)
    pw = (mask * 0.5 * jnp.square(ad) + (1.0 - mask) * ad - 0.5).sum(-1)
    return pw / n_q * weights


if __name__ == "__main__":
    key = jax.random.PRNGKey(0)
    k1, k2, k3, k4, k5, k6 = jax.random.split(key, 6)

    # case 1: tile-aligned shape
    B, H, W = 2, 16, 16
    gt = jax.random.uniform(k1, (B, H, W, 4), jnp.float32, 0.5, 4.0)
    netout = gt + jax.random.normal(k2, (B, H, W, 4), jnp.float32) * 1.5
    weights = jax.random.uniform(k3, (B, H, W), jnp.float32)

    out = jax.block_until_ready(smooth_l1_loss(netout, gt, weights))
    ref = _reference(netout, gt, weights)
    assert out.shape == (B, H, W)
    assert jnp.allclose(out, ref, atol=5e-5, rtol=5e-5), "mismatch vs reference (aligned)"

    # case 2: non-divisible shape (exercises the padding path)
    B2, H2, W2 = 1, 7, 9
    gt_b = jax.random.uniform(k4, (B2, H2, W2, 4), jnp.float32, 0.5, 4.0)
    net_b = gt_b + jax.random.normal(k5, (B2, H2, W2, 4), jnp.float32) * 1.5
    w_b = jax.random.uniform(k6, (B2, H2, W2), jnp.float32)

    out_b = jax.block_until_ready(smooth_l1_loss(net_b, gt_b, w_b))
    ref_b = _reference(net_b, gt_b, w_b)
    assert out_b.shape == (B2, H2, W2)
    assert jnp.allclose(out_b, ref_b, atol=5e-5, rtol=5e-5), "mismatch vs reference (ragged)"

    print("KERNEL_OK")
</pallas_src>

<mosaic_0001>
module attributes {stable_mosaic.version = 11 : i64} {
  func.func @_smooth_l1_kernel(%arg0: i32, %arg1: memref<8x256xf32, #tpu.memory_space<vmem>>, %arg2: memref<8x256xf32, #tpu.memory_space<vmem>>, %arg3: memref<8x64xf32, #tpu.memory_space<vmem>>, %arg4: memref<256x64xf32, #tpu.memory_space<vmem>>, %arg5: memref<256x64xf32, #tpu.memory_space<vmem>>, %arg6: memref<256x64xf32, #tpu.memory_space<vmem>>, %arg7: memref<8x64xf32, #tpu.memory_space<vmem>>) attributes {dimension_semantics = [#tpu.dimension_semantics<parallel>], iteration_bounds = array<i64: 1>, scalar_prefetch = 0 : i64, scratch_operands = 0 : i64, tpu.core_type = #tpu.core_type<tc>, window_params = [{transform_indices = @transform_0, window_bounds = array<i64: 8, 256>}, {transform_indices = @transform_1, window_bounds = array<i64: 8, 256>}, {transform_indices = @transform_2, window_bounds = array<i64: 8, 64>}, {pipeline_mode = #tpu.pipeline_mode<synchronous>, transform_indices = @transform_3, window_bounds = array<i64: 256, 64>}, {pipeline_mode = #tpu.pipeline_mode<synchronous>, transform_indices = @transform_4, window_bounds = array<i64: 256, 64>}, {pipeline_mode = #tpu.pipeline_mode<synchronous>, transform_indices = @transform_5, window_bounds = array<i64: 256, 64>}, {transform_indices = @transform_6, window_bounds = array<i64: 8, 64>}]} {
    %c0 = arith.constant 0 : index
    %c0_0 = arith.constant 0 : index
    %0 = vector.load %arg1[%c0, %c0_0] : memref<8x256xf32, #tpu.memory_space<vmem>>, vector<8x256xf32>
    %c0_1 = arith.constant 0 : index
    %c0_2 = arith.constant 0 : index
    %1 = vector.load %arg2[%c0_1, %c0_2] : memref<8x256xf32, #tpu.memory_space<vmem>>, vector<8x256xf32>
    %2 = arith.subf %0, %1 : vector<8x256xf32>
    %3 = math.absf %2 : vector<8x256xf32>
    %cst = arith.constant 1.000000e+00 : f32
    %4 = vector.broadcast %cst : f32 to vector<8x256xf32>
    %5 = arith.cmpf olt, %3, %4 : vector<8x256xf32>
    %cst_3 = arith.constant 5.000000e-01 : f32
    %6 = vector.broadcast %cst_3 : f32 to vector<8x256xf32>
    %7 = arith.mulf %6, %3 : vector<8x256xf32>
    %8 = arith.mulf %7, %3 : vector<8x256xf32>
    %9 = arith.select %5, %8, %3 : vector<8x256xi1>, vector<8x256xf32>
    %cst_4 = arith.constant 5.000000e-01 : f32
    %10 = vector.broadcast %cst_4 : f32 to vector<8x256xf32>
    %11 = arith.subf %9, %10 : vector<8x256xf32>
    %c0_5 = arith.constant 0 : index
    %c0_6 = arith.constant 0 : index
    %12 = vector.load %arg4[%c0_5, %c0_6] : memref<256x64xf32, #tpu.memory_space<vmem>>, vector<256x64xf32>
    %cst_7 = arith.constant dense<0.000000e+00> : vector<8x64xf32>
    %13 = tpu.matmul %11, %12, %cst_7 {dimension_numbers = #tpu.dot_dimension_numbers<[1], [0], [0], [1], [0, 0, 1, 1], [], []>, precision = #tpu.contract_precision<fp32>} : vector<8x256xf32>, vector<256x64xf32>, vector<8x64xf32> -> vector<8x64xf32>
    %c0_8 = arith.constant 0 : index
    %c0_9 = arith.constant 0 : index
    %14 = vector.load %arg5[%c0_8, %c0_9] : memref<256x64xf32, #tpu.memory_space<vmem>>, vector<256x64xf32>
    %cst_10 = arith.constant dense<0.000000e+00> : vector<8x64xf32>
    %15 = tpu.matmul %1, %14, %cst_10 {dimension_numbers = #tpu.dot_dimension_numbers<[1], [0], [0], [1], [0, 0, 1, 1], [], []>, precision = #tpu.contract_precision<fp32>} : vector<8x256xf32>, vector<256x64xf32>, vector<8x64xf32> -> vector<8x64xf32>
    %c0_11 = arith.constant 0 : index
    %c0_12 = arith.constant 0 : index
    %16 = vector.load %arg6[%c0_11, %c0_12] : memref<256x64xf32, #tpu.memory_space<vmem>>, vector<256x64xf32>
    %cst_13 = arith.constant dense<0.000000e+00> : vector<8x64xf32>
    %17 = tpu.matmul %1, %16, %cst_13 {dimension_numbers = #tpu.dot_dimension_numbers<[1], [0], [0], [1], [0, 0, 1, 1], [], []>, precision = #tpu.contract_precision<fp32>} : vector<8x256xf32>, vector<256x64xf32>, vector<8x64xf32> -> vector<8x64xf32>
    %18 = arith.mulf %15, %15 : vector<8x64xf32>
    %19 = arith.mulf %17, %17 : vector<8x64xf32>
    %20 = arith.addf %18, %19 : vector<8x64xf32>
    %21 = math.sqrt %20 : vector<8x64xf32>
    %cst_14 = arith.constant 4.000000e+00 : f32
    %22 = vector.broadcast %cst_14 : f32 to vector<8x64xf32>
    %23 = arith.mulf %21, %22 : vector<8x64xf32>
    %cst_15 = arith.constant 9.99999974E-5 : f32
    %24 = vector.broadcast %cst_15 : f32 to vector<8x64xf32>
    %25 = arith.addf %23, %24 : vector<8x64xf32>
    %26 = arith.divf %13, %25 : vector<8x64xf32>
    %c0_16 = arith.constant 0 : index
    %c0_17 = arith.constant 0 : index
    %27 = vector.load %arg3[%c0_16, %c0_17] : memref<8x64xf32, #tpu.memory_space<vmem>>, vector<8x64xf32>
    %28 = arith.mulf %26, %27 : vector<8x64xf32>
    %c0_18 = arith.constant 0 : index
    %c0_19 = arith.constant 0 : index
    %29 = vector.load %arg7[%c0_18, %c0_19] : memref<8x64xf32, #tpu.memory_space<vmem>>, vector<8x64xf32>
    tpu.vector_store %arg7[%c0_18, %c0_19], %28 {strides = array<i32>} : memref<8x64xf32, #tpu.memory_space<vmem>>, vector<8x64xf32>,
    return
  }
  func.func @transform_0(%arg0: i32) -> (i32, i32) {
    %c0_i32 = arith.constant 0 : i32
    %c0_i32_0 = arith.constant 0 : i32
    return %arg0, %c0_i32 : i32, i32
  }
  func.func @transform_1(%arg0: i32) -> (i32, i32) {
    %c0_i32 = arith.constant 0 : i32
    %c0_i32_0 = arith.constant 0 : i32
    return %arg0, %c0_i32 : i32, i32
  }
  func.func @transform_2(%arg0: i32) -> (i32, i32) {
    %c0_i32 = arith.constant 0 : i32
    %c0_i32_0 = arith.constant 0 : i32
    return %arg0, %c0_i32 : i32, i32
  }
  func.func @transform_3(%arg0: i32) -> (i32, i32) {
    %c0_i32 = arith.constant 0 : i32
    %c0_i32_0 = arith.constant 0 : i32
    %c0_i32_1 = arith.constant 0 : i32
    return %c0_i32, %c0_i32_0 : i32, i32
  }
  func.func @transform_4(%arg0: i32) -> (i32, i32) {
    %c0_i32 = arith.constant 0 : i32
    %c0_i32_0 = arith.constant 0 : i32
    %c0_i32_1 = arith.constant 0 : i32
    return %c0_i32, %c0_i32_0 : i32, i32
  }
  func.func @transform_5(%arg0: i32) -> (i32, i32) {
    %c0_i32 = arith.constant 0 : i32
    %c0_i32_0 = arith.constant 0 : i32
    %c0_i32_1 = arith.constant 0 : i32
    return %c0_i32, %c0_i32_0 : i32, i32
  }
  func.func @transform_6(%arg0: i32) -> (i32, i32) {
    %c0_i32 = arith.constant 0 : i32
    %c0_i32_0 = arith.constant 0 : i32
    return %arg0, %c0_i32 : i32, i32
  }
}

</mosaic_0001>

<bundles_post_ra>
// kernel: tpu_custom_call.1
= control target key start
LH: loop header
LB: loop body
LE: loop exit
PB: predicated region body
PF: predicated region fallthrough
CT: control target
= control target key end

     0   :  { %s4145_s0 = inlined_call_operand.vmem [shape: f32[8,256], index: 0, kind: input, shape index: {}]   ;;  %s4146_s1 = inlined_call_operand.vmem [shape: f32[8,256], index: 1, kind: input, shape index: {}]   ;;  %s4147_s2 = inlined_call_operand.vmem [shape: f32[8,64], index: 2, kind: input, shape index: {}]   ;;  %s4148_s3 = inlined_call_operand.vmem [shape: f32[256,64], index: 3, kind: input, shape index: {}]   ;;  %s4149_s4 = inlined_call_operand.vmem [shape: f32[256,64], index: 4, kind: input, shape index: {}]   ;;  %s4150_s5 = inlined_call_operand.vmem [shape: f32[256,64], index: 5, kind: input, shape index: {}]   ;;  %s4151_s6 = inlined_call_operand.hbm [shape: f32[8,64], index: 6, kind: output, shape index: {}]  }
   0x1   :  { %v57_v0 = vld [vmem:[%s4148_s3 + $0x78] sm:$0xff]  ;;  %v56_v1 = vld [vmem:[%s4148_s3 + $0x70] sm:$0xff]  ;;  %v55_v2 = vld [vmem:[%s4148_s3 + $0x68] sm:$0xff] }
   0x2   :  { %v2315_v3 = vand.u32 4294901760, %v57_v0  ;;  %v2317_v4 = vand.u32 4294901760, %v56_v1  ;;  %v2319_v5 = vand.u32 4294901760, %v55_v2  ;;  %v54_v6 = vld [vmem:[%s4148_s3 + $0x60] sm:$0xff]  ;;  %v53_v7 = vld [vmem:[%s4148_s3 + $0x58] sm:$0xff]  ;;  %v52_v8 = vld [vmem:[%s4148_s3 + $0x50] sm:$0xff] }
   0x3   :  { %v2330_v9 = vand.u32 4294901760, %v54_v6  ;;  %v2332_v10 = vand.u32 4294901760, %v53_v7  ;;  %v2334_v11 = vand.u32 4294901760, %v52_v8  ;;  %v51_v12 = vld [vmem:[%s4148_s3 + $0x48] sm:$0xff]  ;;  %v50_v13 = vld [vmem:[%s4148_s3 + $0x40] sm:$0xff]  ;;  %v49_v18 = vld [vmem:[%s4148_s3 + $0x38] sm:$0xff] }
   0x4   :  { %75 = vmatpush.msra.mxu0 %v2315_v3  ;;  %v2344_v14 = vsub.f32 %v57_v0, %v2315_v3  ;;  %v2347_v15 = vsub.f32 %v56_v1, %v2317_v4  ;;  %271 = vmatpush.msra.mxu3 %v2315_v3  ;;  %v2351_v16 = vsub.f32 %v55_v2, %v2319_v5  ;;  %v2353_v17 = vand.u32 4294901760, %v51_v12  ;;  %v48_v26 = vld [vmem:[%s4148_s3 + $0x30] sm:$0xff]  ;;  %v47_v34 = vld [vmem:[%s4148_s3 + $0x28] sm:$0xff] }
   0x5   :  { %v2359_v19 = vsub.f32 %v54_v6, %v2330_v9  ;;  %v2362_v20 = vsub.f32 %v53_v7, %v2332_v10  ;;  %v2364_v21 = vand.u32 4294901760, %v50_v13  ;;  %v2372_v25 = vsub.f32 %v52_v8, %v2334_v11 }
   0x6   :  { %77 = vmatpush.msra.mxu0 %v2317_v4  ;;  %218 = vmatpush.msra.mxu2 %v2344_v14  ;;  %v117_v22 = vand.u32 4294901760, %v2344_v14  ;;  %v4167_v23 = vand.u32 4294901760, %v2347_v15  ;;  %v4165_v24 = vand.u32 4294901760, %v2351_v16  ;;  %v2379_v28 = vand.u32 4294901760, %v49_v18 }
   0x7   :  { %273 = vmatpush.msra.mxu3 %v2317_v4  ;;  %v4164_v27 = vand.u32 4294901760, %v2359_v19  ;;  %v2382_v29 = vsub.f32 %v51_v12, %v2353_v17  ;;  %v4161_v33 = vand.u32 4294901760, %v2362_v20 }
   0x8   :  { %79 = vmatpush.msra.mxu0 %v2319_v5  ;;  %221 = vmatpush.msra.mxu2 %v2347_v15  ;;  %v118_v30 = vsub.f32 %v2344_v14, %v117_v22  ;;  %v124_v31 = vsub.f32 %v2347_v15, %v4167_v23  ;;  %v130_v32 = vsub.f32 %v2351_v16, %v4165_v24 }
   0x9   :  { %11 = vsyncpa [#allocation3], 0  ;;  %275 = vmatpush.msra.mxu3 %v2319_v5  ;;  %v2400_v35 = vand.u32 4294901760, %v48_v26  ;;  %v2403_v36 = vsub.f32 %v50_v13, %v2364_v21  ;;  %v136_v39 = vsub.f32 %v2359_v19, %v4164_v27  ;;  %v4160_v40 = vand.u32 4294901760, %v2372_v25  ;;  %v46_v42 = vld [vmem:[%s4148_s3 + $0x20] sm:$0xff]  ;;  %v45_v48 = vld [vmem:[%s4148_s3 + $0x18] sm:$0xff] }
   0xa   :  { %81 = vmatpush.msra.mxu0 %v2330_v9  ;;  %v119_v37 = vand.u32 4294901760, %v118_v30  ;;  %224 = vmatpush.msra.mxu2 %v2351_v16  ;;  %v125_v38 = vand.u32 4294901760, %v124_v31  ;;  %v2412_v41 = vand.u32 4294901760, %v47_v34  ;;  %v131_v43 = vand.u32 4294901760, %v130_v32  ;;  %v44_v54 = vld [vmem:[%s4148_s3 + $0x10] sm:$0xff]  ;;  %v73_v59 = vld [vmem:[%s4148_s3 + $0xf8] sm:$0xff] }
   0xb   :  { %277 = vmatpush.msra.mxu3 %v2330_v9  ;;  %v142_v44 = vsub.f32 %v2362_v20, %v4161_v33  ;;  %v4158_v45 = vand.u32 4294901760, %v2382_v29  ;;  %v2423_v46 = vsub.f32 %v49_v18, %v2379_v28  ;;  %v4157_v47 = vand.u32 4294901760, %v2403_v36  ;;  %v43_v61 = vld [vmem:[%s4148_s3 + $0x8] sm:$0xff]  ;;  %v72_v2 = vld [vmem:[%s4148_s3 + $0xf0] sm:$0xff]  ;;  %v42_v7 = vld [vmem:[%s4148_s3] sm:$0xff]  ;;  %s2270_s15 = smov [#allocation2]  }
   0xc   :  { %83 = vmatpush.msra.mxu0 %v2332_v10  ;;  %120 = vmatpush.msra.mxu1 %v119_v37  ;;  %v137_v49 = vand.u32 4294901760, %v136_v39  ;;  %v148_v50 = vsub.f32 %v2372_v25, %v4160_v40  ;;  %v2435_v51 = vand.u32 4294901760, %v46_v42  ;;  %v2438_v52 = vsub.f32 %v48_v26, %v2400_v35  ;;  %v71_v32 = vld [vmem:[%s4148_s3 + $0xe8] sm:$0xff]  ;;  %v64_v23 = vld [vmem:[%s4148_s3 + $0xb0] sm:$0xff]  ;;  %s2225_s16 = sshll.u32 %s2270_s15, 4  ;;  %s2227_s19 = sshll.u32 %s4151_s6, 4  ;;  %s2226_s16 = int_to_ptr.vmem [resolvable:$true] %s2225_s16  ;;  %s2228_s19 = int_to_ptr.hbm [resolvable:$true] %s2227_s19 }
   0xd   :  { %227 = vmatpush.msra.mxu2 %v2359_v19  ;;  %279 = vmatpush.msra.mxu3 %v2332_v10  ;;  %v2443_v53 = vsub.f32 %v47_v34, %v2412_v41  ;;  %v143_v55 = vand.u32 4294901760, %v142_v44  ;;  %v154_v56 = vsub.f32 %v2382_v29, %v4158_v45  ;;  %v2452_v57 = vand.u32 4294901760, %v45_v48  ;;  %v63_v14 = vld [vmem:[%s4148_s3 + $0xa8] sm:$0xff] }
   0xe   :  { %85 = vmatpush.msra.mxu0 %v2334_v11  ;;  %126 = vmatpush.msra.mxu1 %v125_v38  ;;  %v4156_v58 = vand.u32 4294901760, %v2423_v46  ;;  %v160_v60 = vsub.f32 %v2403_v36, %v4157_v47  ;;  %v149_v62 = vand.u32 4294901760, %v148_v50  ;;  %v2467_v63 = vand.u32 4294901760, %v44_v54 }
   0xf   :  { %230 = vmatpush.msra.mxu2 %v2362_v20  ;;  %281 = vmatpush.msra.mxu3 %v2334_v11  ;;  %v4154_v0 = vand.u32 4294901760, %v2438_v52  ;;  %v2471_v1 = vsub.f32 %v46_v42, %v2435_v51  ;;  %v4153_v6 = vand.u32 4294901760, %v2443_v53  ;;  %v2482_v8 = vand.u32 4294901760, %v73_v59  ;;  %v70_v42 = vld [vmem:[%s4148_s3 + $0xe0] sm:$0xff] }
  0x10   :  { %87 = vmatpush.msra.mxu0 %v2353_v17  ;;  %132 = vmatpush.msra.mxu1 %v131_v43  ;;  %4227 = vst [vmem:[#allocation5_spill] sm:$0xff] %v2467_v63  ;;  %v155_v12 = vand.u32 4294901760, %v154_v56  ;;  %v166_v13 = vsub.f32 %v2423_v46, %v4156_v58  ;;  %v2488_v18 = vand.u32 4294901760, %v43_v61  ;;  %v2491_v26 = vsub.f32 %v45_v48, %v2452_v57 }
  0x11   :  { %233 = vmatpush.msra.mxu2 %v2372_v25  ;;  %283 = vmatpush.msra.mxu3 %v2353_v17  ;;  %v161_v30 = vand.u32 4294901760, %v160_v60  ;;  %v2495_v31 = vand.u32 4294901760, %v72_v2  ;;  %v172_v34 = vsub.f32 %v2438_v52, %v4154_v0  ;;  %v2504_v37 = vand.u32 4294901760, %v42_v7 }
  0x12   :  { %89 = vmatpush.msra.mxu0 %v2364_v21  ;;  %138 = vmatpush.msra.mxu1 %v137_v49  ;;  %4228 = vst [vmem:[#allocation6_spill] sm:$0xff] %v2488_v18  ;;  %v4152_v38 = vand.u32 4294901760, %v2471_v1  ;;  %v2508_v39 = vsub.f32 %v44_v54, %v2467_v63  ;;  %v178_v43 = vsub.f32 %v2443_v53, %v4153_v6  ;;  %v167_v48 = vand.u32 4294901760, %v166_v13  ;;  %v67_v6 = vld [vmem:[%s4148_s3 + $0xc8] sm:$0xff] }
  0x13   :  { %236 = vmatpush.msra.mxu2 %v2382_v29  ;;  %285 = vmatpush.msra.mxu3 %v2364_v21  ;;  %4229 = vst [vmem:[#allocation7_spill] sm:$0xff] %v2495_v31  ;;  %v2519_v44 = vsub.f32 %v73_v59, %v2482_v8  ;;  %v4155_v49 = vand.u32 4294901760, %v2491_v26  ;;  %v2524_v50 = vsub.f32 %v43_v61, %v2488_v18  ;;  %v2526_v54 = vand.u32 4294901760, %v71_v32  ;;  %v69_v59 = vld [vmem:[%s4148_s3 + $0xd8] sm:$0xff] }
  0x14   :  { %91 = vmatpush.msra.mxu0 %v2379_v28  ;;  %144 = vmatpush.msra.mxu1 %v143_v55  ;;  %4230 = vst [vmem:[#allocation8_spill] sm:$0xff] %v2504_v37  ;;  %v2531_v55 = vsub.f32 %v72_v2, %v2495_v31  ;;  %v2533_v56 = vand.u32 4294901760, %v70_v42  ;;  %v173_v60 = vand.u32 4294901760, %v172_v34  ;;  %v184_v61 = vsub.f32 %v2471_v1, %v4152_v38 }
  0x15   :  { %239 = vmatpush.msra.mxu2 %v2403_v36  ;;  %287 = vmatpush.msra.mxu3 %v2379_v28  ;;  %v179_v2 = vand.u32 4294901760, %v178_v43  ;;  %v4162_v13 = vand.u32 4294901760, %v2519_v44  ;;  %v190_v34 = vsub.f32 %v2491_v26, %v4155_v49  ;;  %v2558_v38 = vsub.f32 %v71_v32, %v2526_v54 }
  0x16   :  { %93 = vmatpush.msra.mxu0 %v2400_v35  ;;  %150 = vmatpush.msra.mxu1 %v149_v62  ;;  %v4159_v62 = vand.u32 4294901760, %v2508_v39  ;;  %v2560_v43 = vand.u32 4294901760, %v69_v59  ;;  %v2569_v0 = vsub.f32 %v70_v42, %v2533_v56  ;;  %v185_v32 = vand.u32 4294901760, %v184_v61 }
  0x17   :  { %242 = vmatpush.msra.mxu2 %v2423_v46  ;;  %289 = vmatpush.msra.mxu3 %v2400_v35  ;;  %v459_v42 = vsub.f32 %v2519_v44, %v4162_v13  ;;  %v2583_v45 = vand.u32 4294901760, %v67_v6  ;;  %v191_v61 = vand.u32 4294901760, %v190_v34  ;;  %v65_v13 = vld [vmem:[%s4148_s3 + $0xb8] sm:$0xff]  ;;  %vm2218_vm8 = vcmask 523264  }
  0x18   :  { %95 = vmatpush.msra.mxu0 %v2412_v41  ;;  %156 = vmatpush.msra.mxu1 %v155_v12  ;;  %v2544_v12 = vsub.f32 %v42_v7, %v2504_v37  ;;  %v4163_v7 = vand.u32 4294901760, %v2524_v50  ;;  %v196_v49 = vsub.f32 %v2508_v39, %v4159_v62  ;;  %v2594_v33 = vsub.f32 %v69_v59, %v2560_v43  ;;  %v2611_v59 = vld [vmem:[%s4146_s1] sm:$0xff] }
  0x19   :  { %245 = vmatpush.msra.mxu2 %v2438_v52  ;;  %291 = vmatpush.msra.mxu3 %v2412_v41  ;;  %4231 = vst [vmem:[#allocation9_spill] sm:$0xff] %v2611_v59  ;;  %v2631_v40 = vand.u32 4294901760, %v65_v13 }
  0x1a   :  { %97 = vmatpush.msra.mxu0 %v2435_v51  ;;  %162 = vmatpush.msra.mxu1 %v161_v30  ;;  %v68_v30 = vld [vmem:[%s4148_s3 + $0xd0] sm:$0xff]  ;;  %v4168_v58 = vand.u32 4294901760, %v2544_v12  ;;  %v202_v62 = vsub.f32 %v2524_v50, %v4163_v7  ;;  %v24_v7 = vld [vmem:[%s4145_s0] sm:$0xff]  ;;  %v197_v27 = vand.u32 4294901760, %v196_v49  ;;  %v2629_v49 = vsub.f32 %v67_v6, %v2583_v45 }
  0x1b   :  { %248 = vmatpush.msra.mxu2 %v2443_v53  ;;  %293 = vmatpush.msra.mxu3 %v2435_v51  ;;  %v2576_v47 = vand.u32 4294901760, %v68_v30  ;;  %v4233_v6 = vand.u32 4294901760, %v2347_v15 }
  0x1c   :  { %99 = vmatpush.msra.mxu0 %v2452_v57  ;;  %168 = vmatpush.msra.mxu1 %v167_v48  ;;  %v4166_v48 = vand.u32 4294901760, %v2531_v55  ;;  %v208_v24 = vsub.f32 %v2544_v12, %v4168_v58  ;;  %v4232_v58 = vand.u32 4294901760, %v2558_v38 }
  0x1d   :  { %251 = vmatpush.msra.mxu2 %v2471_v1  ;;  %295 = vmatpush.msra.mxu3 %v2452_v57 }
  0x1e   :  { %101 = vmatpush.msra.mxu0 %v2467_v63  ;;  %174 = vmatpush.msra.mxu1 %v173_v60  ;;  %v66_v60 = vld [vmem:[%s4148_s3 + $0xc0] sm:$0xff] }
  0x1f   :  { %254 = vmatpush.msra.mxu2 %v2491_v26  ;;  %297 = vmatpush.msra.mxu3 %v2467_v63  ;;  %v2620_v34 = vand.u32 4294901760, %v66_v60 }
  0x20   :  { %103 = vmatpush.msra.mxu0 %v2488_v18  ;;  %180 = vmatpush.msra.mxu1 %v179_v2  ;;  %v465_v2 = vsub.f32 %v2531_v55, %v4166_v48  ;;  %v2618_v48 = vsub.f32 %v68_v30, %v2576_v47  ;;  %v203_v30 = vand.u32 4294901760, %v202_v62 }
  0x21   :  { %257 = vmatpush.msra.mxu2 %v2508_v39  ;;  %299 = vmatpush.msra.mxu3 %v2488_v18  ;;  %v471_v18 = vsub.f32 %v2558_v38, %v4232_v58  ;;  %v209_v58 = vand.u32 4294901760, %v208_v24 }
  0x22   :  { %105 = vmatpush.msra.mxu0 %v2504_v37  ;;  %186 = vmatpush.msra.mxu1 %v185_v32  ;;  %v460_v32 = vand.u32 4294901760, %v459_v42  ;;  %v466_v62 = vand.u32 4294901760, %v465_v2  ;;  %v4234_v42 = vand.u32 4294901760, %v2569_v0  ;;  %v25_v2 = vld [vmem:[%s4145_s0 + $0x8] sm:$0xff] }
  0x23   :  { %260 = vmatpush.msra.mxu2 %v2524_v50  ;;  %301 = vmatpush.msra.mxu3 %v2504_v37  ;;  %v2648_v37 = vand.u32 4294901760, %v64_v23  ;;  %v472_v63 = vand.u32 4294901760, %v471_v18 }
  0x24   :  { %312 = vmatpush.msrb.mxu0 %v117_v22  ;;  %192 = vmatpush.msra.mxu1 %v191_v61  ;;  %v28_v22 = vsub.f32 %v24_v7, %v2611_v59  ;;  %v477_v61 = vsub.f32 %v2569_v0, %v4234_v42  ;;  %v2653_v7 = vsub.f32 %v66_v60, %v2620_v34  ;;  %v2669_v60 = vand.u32 4294901760, %v63_v14 }
  0x25   :  { %263 = vmatpush.msra.mxu2 %v2544_v12  ;;  %461 = vmatpush.msrb.mxu3 %v460_v32  ;;  %v2667_v42 = vsub.f32 %v65_v13, %v2631_v40  ;;  %v4237_v59 = vand.u32 4294901760, %v2594_v33  ;;  %v2681_v24 = vsub.f32 %v64_v23, %v2648_v37 }
  0x26   :  { %316 = vmatpush.msrb.mxu0 %v4233_v6  ;;  %198 = vmatpush.msra.mxu1 %v197_v27  ;;  %v30_v15 = vand.u32 2147483647, %v28_v22  ;;  %v2661_v6 = vld [vmem:[%s4146_s1 + $0x8] sm:$0xff]  ;;  %v4236_v27 = vand.u32 4294901760, %v2351_v16  ;;  %v62_v22 = vld [vmem:[%s4148_s3 + $0xa0] sm:$0xff]  ;;  %v478_v13 = vand.u32 4294901760, %v477_v61 }
  0x27   :  { %416 = vmatpush.msrb.mxu2 %v2482_v8  ;;  %4235 = vst [vmem:[#allocation10_spill] sm:$0xff] %v2661_v6  ;;  %v483_v16 = vsub.f32 %v2594_v33, %v4237_v59  ;;  %467 = vmatpush.msrb.mxu3 %v466_v62  ;;  %v29_v18 = vsub.f32 %v25_v2, %v2661_v6  ;;  %v4239_v59 = vand.u32 4294901760, %v2618_v48  ;;  %v2692_v61 = vand.u32 4294901760, %v62_v22 }
  0x28   :  { %320 = vmatpush.msrb.mxu0 %v4236_v27  ;;  %204 = vmatpush.msra.mxu1 %v203_v30  ;;  %v34_v32 = vmul.f32 0.5, %v30_v15  ;;  %v4238_v27 = vand.u32 4294901760, %v2359_v19  ;;  %v61_v30 = vld [vmem:[%s4148_s3 + $0x98] sm:$0xff]  ;;  %vm32_vm0 = vcmp.lt.f32.partialorder %v30_v15, 1.0  ;;  %v4177_v2 = vand.u32 4294901760, %v2667_v42 }
  0x29   :  { %418 = vmatpush.msrb.mxu2 %v2495_v31  ;;  %v489_v19 = vsub.f32 %v2618_v48, %v4239_v59  ;;  %v4241_v31 = vand.u32 4294901760, %v2629_v49  ;;  %v2702_v6 = vsub.f32 %v63_v14, %v2669_v60  ;;  %v31_v59 = vand.u32 2147483647, %v29_v18  ;;  %473 = vmatpush.msrb.mxu3 %v472_v63  ;;  %v60_v14 = vld [vmem:[%s4148_s3 + $0x90] sm:$0xff] }
  0x2a   :  { %324 = vmatpush.msrb.mxu0 %v4238_v27  ;;  %210 = vmatpush.msra.mxu1 %v209_v58  ;;  %v36_v23 = vmul.f32 %v34_v32, %v30_v15  ;;  %v4240_v27 = vand.u32 4294901760, %v2362_v20  ;;  %v484_v62 = vand.u32 4294901760, %v483_v16  ;;  %v2705_v32 = vand.u32 4294901760, %v61_v30 }
  0x2b   :  { %420 = vmatpush.msrb.mxu2 %v2526_v54  ;;  %v495_v58 = vsub.f32 %v2629_v49, %v4241_v31  ;;  %v4178_v31 = vand.u32 4294901760, %v2681_v24  ;;  %479 = vmatpush.msrb.mxu3 %v478_v13  ;;  %v490_v63 = vand.u32 4294901760, %v489_v19  ;;  %v4243_v16 = vand.u32 4294901760, %v2653_v7 }
  0x2c   :  { %328 = vmatpush.msrb.mxu0 %v4240_v27  ;;  %379 = vmatpush.msrb.mxu1 %v2315_v3  ;;  %v38_v20 = vsel %vm32_vm0, %v36_v23, %v30_v15  ;;  %v4242_v3 = vand.u32 4294901760, %v2372_v25  ;;  %v2720_v25 = vsub.f32 %v62_v22, %v2692_v61  ;;  %v35_v23 = vmul.f32 0.5, %v31_v59  ;;  %v59_v22 = vld [vmem:[%s4148_s3 + $0x88] sm:$0xff] }
  0x2d   :  { %422 = vmatpush.msrb.mxu2 %v2533_v56  ;;  %v2236_v18 = vadd.f32 -0.5, %v38_v20  ;;  %v501_v15 = vsub.f32 %v2653_v7, %v4243_v16  ;;  %v496_v27 = vand.u32 4294901760, %v495_v58  ;;  %v507_v20 = vsub.f32 %v2667_v42, %v4177_v2  ;;  %485 = vmatpush.msrb.mxu3 %v484_v62 }
  0x2e   :  { %332 = vmatpush.msrb.mxu0 %v4242_v3  ;;  %381 = vmatpush.msrb.mxu1 %v2317_v4  ;;  %v4244_v4 = vand.u32 4294901760, %v2382_v29  ;;  %v518_v13 = vand.u32 4294901760, %v2702_v6  ;;  %v2735_v29 = vand.u32 4294901760, %v60_v14  ;;  %vm33_vm1 = vcmp.lt.f32.partialorder %v31_v59, 1.0 }
  0x2f   :  { %424 = vmatpush.msrb.mxu2 %v2560_v43  ;;  %v2729_v19 = vand.u32 4294901760, %v2236_v18  ;;  %v37_v58 = vmul.f32 %v35_v23, %v31_v59  ;;  %v4245_v3 = vand.u32 4294901760, %v2403_v36  ;;  %v513_v16 = vsub.f32 %v2681_v24, %v4178_v31  ;;  %491 = vmatpush.msrb.mxu3 %v490_v63  ;;  %v58_v36 = vld [vmem:[%s4148_s3 + $0x80] sm:$0xff] }
  0x30   :  { %336 = vmatpush.msrb.mxu0 %v4244_v4  ;;  %383 = vmatpush.msrb.mxu1 %v2319_v5  ;;  %v2738_v5 = vsub.f32 %v61_v30, %v2705_v32  ;;  %v502_v62 = vand.u32 4294901760, %v501_v15  ;;  %v524_v4 = vand.u32 4294901760, %v2720_v25  ;;  %v2751_v2 = vand.u32 4294901760, %v59_v22 }
  0x31   :  { %426 = vmatpush.msrb.mxu2 %v2576_v47  ;;  %v2749_v30 = vsub.f32 %v2236_v18, %v2729_v19  ;;  %v39_v23 = vsel %vm33_vm1, %v37_v58, %v31_v59  ;;  %497 = vmatpush.msrb.mxu3 %v496_v27  ;;  %v508_v63 = vand.u32 4294901760, %v507_v20  ;;  %v519_v18 = vsub.f32 %v2702_v6, %v518_v13 }
  0x32   :  { %340 = vmatpush.msrb.mxu0 %v4245_v3  ;;  %385 = vmatpush.msrb.mxu1 %v2330_v9  ;;  %v4246_v9 = vand.u32 4294901760, %v2423_v46  ;;  %v530_v15 = vand.u32 4294901760, %v2738_v5  ;;  %v2765_v3 = vsub.f32 %v60_v14, %v2735_v29  ;;  %v4247_v31 = vand.u32 4294901760, %v2438_v52 }
  0x33   :  { %428 = vmatpush.msrb.mxu2 %v2583_v45  ;;  %v2770_v46 = vand.u32 4294901760, %v58_v36  ;;  %503 = vmatpush.msrb.mxu3 %v502_v62  ;;  %v525_v59 = vsub.f32 %v2720_v25, %v524_v4  ;;  %v108_v27 = vand.u32 4294901760, %v2749_v30  ;;  %v2778_v14 = vsub.f32 %v59_v22, %v2751_v2 }
  0x34   :  { %344 = vmatpush.msrb.mxu0 %v4246_v9  ;;  %387 = vmatpush.msrb.mxu1 %v2332_v10  ;;  %v514_v10 = vand.u32 4294901760, %v513_v16  ;;  %v2237_v20 = vadd.f32 -0.5, %v39_v23  ;;  %v4248_v52 = vand.u32 4294901760, %v2443_v53  ;;  %v536_v58 = vand.u32 4294901760, %v2765_v3 }
  0x35   :  { %430 = vmatpush.msrb.mxu2 %v2620_v34  ;;  %509 = vmatpush.msrb.mxu3 %v508_v63  ;;  %v4249_v16 = vand.u32 4294901760, %v2471_v1  ;;  %v2792_v53 = vsub.f32 %v58_v36, %v2770_v46  ;;  %v109_v22 = vsub.f32 %v2749_v30, %v108_v27  ;;  %v542_v62 = vand.u32 4294901760, %v2778_v14 }
  0x36   :  { %348 = vmatpush.msrb.mxu0 %v4247_v31  ;;  %389 = vmatpush.msrb.mxu1 %v2334_v11  ;;  %v520_v11 = vand.u32 4294901760, %v519_v18  ;;  %v531_v31 = vsub.f32 %v2738_v5, %v530_v15  ;;  %v2797_v9 = vand.u32 4294901760, %v2237_v20  ;;  %v4250_v23 = vand.u32 4294901760, %v2491_v26 }
  0x37   :  { %432 = vmatpush.msrb.mxu2 %v2631_v40  ;;  %515 = vmatpush.msrb.mxu3 %v514_v10  ;;  %v537_v1 = vsub.f32 %v2765_v3, %v536_v58  ;;  %v4251_v36 = vand.u32 4294901760, %v2508_v39  ;;  %v548_v63 = vand.u32 4294901760, %v2792_v53  ;;  %v110_v26 = vand.u32 4294901760, %v109_v22 }
  0x38   :  { %352 = vmatpush.msrb.mxu0 %v4248_v52  ;;  %391 = vmatpush.msrb.mxu1 %v2353_v17  ;;  %v526_v17 = vand.u32 4294901760, %v525_v59  ;;  %v2815_v18 = vsub.f32 %v2237_v20, %v2797_v9  ;;  %v4252_v10 = vand.u32 4294901760, %v2524_v50  ;;  %v4253_v39 = vand.u32 4294901760, %v2544_v12  ;;  %v4256_v52 = vld [vmem:[#allocation6_spill] sm:$0xff] }
  0x39   :  { %434 = vmatpush.msrb.mxu2 %v2648_v37  ;;  %521 = vmatpush.msrb.mxu3 %v520_v11  ;;  %v549_v59 = vsub.f32 %v2792_v53, %v548_v63 }
  0x3a   :  { %356 = vmatpush.msrb.mxu0 %v4249_v16  ;;  %393 = vmatpush.msrb.mxu1 %v2364_v21  ;;  %v532_v21 = vand.u32 4294901760, %v531_v31  ;;  %v449_v20 = vand.u32 4294901760, %v2815_v18  ;;  %v4258_v31 = vld [vmem:[#allocation8_spill] sm:$0xff] }
  0x3b   :  { %436 = vmatpush.msrb.mxu2 %v2669_v60  ;;  %527 = vmatpush.msrb.mxu3 %v526_v17 }
  0x3c   :  { %360 = vmatpush.msrb.mxu0 %v4250_v23  ;;  %395 = vmatpush.msrb.mxu1 %v2379_v28  ;;  %v543_v28 = vsub.f32 %v2778_v14, %v542_v62  ;;  %v450_v12 = vsub.f32 %v2815_v18, %v449_v20 }
  0x3d   :  { %438 = vmatpush.msrb.mxu2 %v2692_v61  ;;  %533 = vmatpush.msrb.mxu3 %v532_v21 }
  0x3e   :  { %364 = vmatpush.msrb.mxu0 %v4251_v36  ;;  %397 = vmatpush.msrb.mxu1 %v2400_v35  ;;  %v538_v35 = vand.u32 4294901760, %v537_v1  ;;  %v544_v50 = vand.u32 4294901760, %v543_v28  ;;  %v451_v11 = vand.u32 4294901760, %v450_v12 }
  0x3f   :  { %440 = vmatpush.msrb.mxu2 %v2705_v32  ;;  %111 = vmatmul.f32.vlgmr.msra.gmra.mxu0 %v110_v26 }
  0x40   :  { %368 = vmatpush.msrb.mxu0 %v4252_v10  ;;  %399 = vmatpush.msrb.mxu1 %v2412_v41  ;;  %v4254_v41 = vld [vmem:[#allocation5_spill] sm:$0xff] }
  0x41   :  { %442 = vmatpush.msrb.mxu2 %v2735_v29  ;;  %539 = vmatpush.msrb.mxu3 %v538_v35 }
  0x42   :  { %372 = vmatpush.msrb.mxu0 %v4253_v39  ;;  %401 = vmatpush.msrb.mxu1 %v2435_v51  ;;  %v550_v51 = vand.u32 4294901760, %v549_v59 }
  0x43   :  { %444 = vmatpush.msrb.mxu2 %v2751_v2  ;;  %545 = vmatpush.msrb.mxu3 %v544_v50 }
  0x44   :  { %559 = vmatpush.msra.mxu0 %v2519_v44  ;;  %403 = vmatpush.msrb.mxu1 %v2452_v57  ;;  %v4255_v57 = vand.u32 4294901760, %v2519_v44  ;;  %v4259_v44 = vand.u32 4294901760, %v2558_v38 }
  0x45   :  { %266 = vmatmul.f32.vlgmr.msra.gmra.mxu2 %v2749_v30  ;;  %305 = vmatmul.f32.vlgmr.msra.gmra.mxu3 %v108_v27  ;;  %v4257_v30 = vand.u32 4294901760, %v2531_v55  ;;  %v4260_v27 = vld [vmem:[#allocation7_spill] sm:$0xff] }
  0x46   :  { %562 = vmatpush.msra.mxu0 %v2531_v55  ;;  %405 = vmatpush.msrb.mxu1 %v4254_v41  ;;  %v4261_v55 = vand.u32 4294901760, %v2569_v0 }
  0x47   :  { %446 = vmatpush.msrb.mxu2 %v2770_v46  ;;  %551 = vmatpush.msrb.mxu3 %v550_v51  ;;  %v759_v51 = vld [vmem:[%s4149_s4 + $0x18] sm:$0xff] }
  0x48   :  { %565 = vmatpush.msra.mxu0 %v2558_v38  ;;  %407 = vmatpush.msrb.mxu1 %v4256_v52  ;;  %v4265_v38 = vand.u32 4294901760, %v2653_v7 }
  0x49   :  { %653 = vmatpush.msra.mxu2 %v4255_v57  ;;  %212 = vmatmul.f32.vlgmr.msra.gmra.mxu1 %v2729_v19 }
  0x4a   :  { %568 = vmatpush.msra.mxu0 %v2569_v0  ;;  %720 = vmatpush.msra.mxu3 %v2482_v8  ;;  %v4263_v0 = vand.u32 4294901760, %v2618_v48 }
  0x4b   :  { %657 = vmatpush.msra.mxu2 %v4257_v30  ;;  %409 = vmatpush.msrb.mxu1 %v4258_v31  ;;  %v758_v31 = vld [vmem:[%s4149_s4 + $0x10] sm:$0xff] }
  0x4c   :  { %571 = vmatpush.msra.mxu0 %v2594_v33  ;;  %722 = vmatpush.msra.mxu3 %v4260_v27 }
  0x4d   :  { %612 = vmatpush.msra.mxu1 %v2482_v8  ;;  %661 = vmatpush.msra.mxu2 %v4259_v44  ;;  %v4262_v8 = vand.u32 4294901760, %v2594_v33  ;;  %v4264_v33 = vand.u32 4294901760, %v2629_v49 }
  0x4e   :  { %452 = vmatmul.f32.vlgmr.msrb.gmra.mxu2 %v451_v11  ;;  %574 = vmatpush.msra.mxu0 %v2618_v48  ;;  %v769_v48 = vld [vmem:[%s4149_s4 + $0x68] sm:$0xff] }
  0x4f   :  { %614 = vmatpush.msra.mxu1 %v4260_v27  ;;  %665 = vmatpush.msra.mxu2 %v4261_v55  ;;  %v3069_v55 = vand.u32 4294901760, %v759_v51 }
  0x50   :  { %724 = vmatpush.msra.mxu3 %v2526_v54  ;;  %374 = vmatmul.f32.vlgmr.msrb.gmra.mxu0 %v2729_v19 }
  0x51   :  { %553 = vmatmul.f32.vlgmr.msrb.gmra.mxu3 %v2797_v9  ;;  %577 = vmatpush.msra.mxu0 %v2629_v49  ;;  %v768_v49 = vld [vmem:[%s4149_s4 + $0x60] sm:$0xff] }
  0x52   :  { %616 = vmatpush.msra.mxu1 %v2526_v54  ;;  %669 = vmatpush.msra.mxu2 %v4262_v8  ;;  %v771_v54 = vld [vmem:[%s4149_s4 + $0x78] sm:$0xff] }
  0x53   :  { %726 = vmatpush.msra.mxu3 %v2533_v56  ;;  %411 = vmatmul.f32.vlgmr.msrb.gmra.mxu1 %v2729_v19 }
  0x54   :  { %580 = vmatpush.msra.mxu0 %v2653_v7  ;;  %618 = vmatpush.msra.mxu1 %v2533_v56  ;;  %v4266_v56 = vand.u32 4294901760, %v2667_v42 }
  0x55   :  { %673 = vmatpush.msra.mxu2 %v4263_v0  ;;  %728 = vmatpush.msra.mxu3 %v2560_v43 }
  0x56   :  { %583 = vmatpush.msra.mxu0 %v2667_v42  ;;  %620 = vmatpush.msra.mxu1 %v2560_v43  ;;  %v4267_v43 = vand.u32 4294901760, %v2681_v24  ;;  %v766_v42 = vld [vmem:[%s4149_s4 + $0x50] sm:$0xff] }
  0x57   :  { %677 = vmatpush.msra.mxu2 %v4264_v33  ;;  %730 = vmatpush.msra.mxu3 %v2576_v47  ;;  %v2957_v19 = vand.u32 4294901760, %v766_v42  ;;  %v757_v33 = vld [vmem:[%s4149_s4 + $0x8] sm:$0xff] }
  0x58   :  { %586 = vmatpush.msra.mxu0 %v2681_v24  ;;  %622 = vmatpush.msra.mxu1 %v2576_v47  ;;  %v770_v47 = vld [vmem:[%s4149_s4 + $0x70] sm:$0xff] }
  0x59   :  { %681 = vmatpush.msra.mxu2 %v4265_v38  ;;  %732 = vmatpush.msra.mxu3 %v2583_v45  ;;  %v2994_v22 = vsub.f32 %v766_v42, %v2957_v19  ;;  %v3101_v42 = vand.u32 4294901760, %v757_v33 }
  0x5a   :  { %589 = vmatpush.msra.mxu0 %v2702_v6  ;;  %624 = vmatpush.msra.mxu1 %v2583_v45  ;;  %v2897_v45 = vand.u32 4294901760, %v771_v54  ;;  %v2930_v6 = vand.u32 4294901760, %v768_v49 }
  0x5b   :  { %685 = vmatpush.msra.mxu2 %v4266_v56  ;;  %734 = vmatpush.msra.mxu3 %v2620_v34  ;;  %v4188_v10 = vand.u32 4294901760, %v2994_v22  ;;  %v3084_v56 = vand.u32 4294901760, %v758_v31 }
  0x5c   :  { %592 = vmatpush.msra.mxu0 %v2720_v25  ;;  %626 = vmatpush.msra.mxu1 %v2620_v34  ;;  %v2907_v34 = vand.u32 4294901760, %v770_v47  ;;  %v2920_v7 = vsub.f32 %v771_v54, %v2897_v45 }
  0x5d   :  { %689 = vmatpush.msra.mxu2 %v4267_v43  ;;  %736 = vmatpush.msra.mxu3 %v2631_v40  ;;  %v862_v57 = vsub.f32 %v2994_v22, %v4188_v10  ;;  %v787_v43 = vld [vmem:[%s4149_s4 + $0xf8] sm:$0xff] }
  0x5e   :  { %595 = vmatpush.msra.mxu0 %v2738_v5  ;;  %628 = vmatpush.msra.mxu1 %v2631_v40  ;;  %v2917_v40 = vand.u32 4294901760, %v769_v48  ;;  %v2933_v24 = vsub.f32 %v770_v47, %v2907_v34  ;;  %v831_v25 = vand.u32 4294901760, %v2920_v7 }
  0x5f   :  { %693 = vmatpush.msra.mxu2 %v518_v13  ;;  %738 = vmatpush.msra.mxu3 %v2648_v37  ;;  %v863_v38 = vand.u32 4294901760, %v862_v57 }
  0x60   :  { %598 = vmatpush.msra.mxu0 %v2765_v3  ;;  %630 = vmatpush.msra.mxu1 %v2648_v37  ;;  %v767_v37 = vld [vmem:[%s4149_s4 + $0x58] sm:$0xff]  ;;  %v2947_v13 = vsub.f32 %v769_v48, %v2917_v40  ;;  %v837_v5 = vand.u32 4294901760, %v2933_v24 }
  0x61   :  { %697 = vmatpush.msra.mxu2 %v524_v4  ;;  %740 = vmatpush.msra.mxu3 %v2669_v60  ;;  %v2961_v4 = vsub.f32 %v768_v49, %v2930_v6  ;;  %v756_v49 = vld [vmem:[%s4149_s4] sm:$0xff] }
  0x62   :  { %601 = vmatpush.msra.mxu0 %v2778_v14  ;;  %632 = vmatpush.msra.mxu1 %v2669_v60  ;;  %v2943_v60 = vand.u32 4294901760, %v767_v37  ;;  %v843_v14 = vand.u32 4294901760, %v2947_v13  ;;  %v838_v16 = vsub.f32 %v2933_v24, %v837_v5 }
  0x63   :  { %701 = vmatpush.msra.mxu2 %v530_v15  ;;  %742 = vmatpush.msra.mxu3 %v2692_v61  ;;  %v832_v15 = vsub.f32 %v2920_v7, %v831_v25  ;;  %v849_v17 = vand.u32 4294901760, %v2961_v4 }
  0x64   :  { %604 = vmatpush.msra.mxu0 %v2792_v53  ;;  %634 = vmatpush.msra.mxu1 %v2692_v61  ;;  %v765_v61 = vld [vmem:[%s4149_s4 + $0x48] sm:$0xff]  ;;  %v844_v1 = vsub.f32 %v2947_v13, %v843_v14  ;;  %v839_v26 = vand.u32 4294901760, %v838_v16  ;;  %v786_v16 = vld [vmem:[%s4149_s4 + $0xf0] sm:$0xff] }
  0x65   :  { %705 = vmatpush.msra.mxu2 %v536_v58  ;;  %744 = vmatpush.msra.mxu3 %v2705_v32  ;;  %v2974_v3 = vand.u32 4294901760, %v765_v61  ;;  %v2978_v58 = vsub.f32 %v767_v37, %v2943_v60  ;;  %v833_v21 = vand.u32 4294901760, %v832_v15  ;;  %v850_v28 = vsub.f32 %v2961_v4, %v849_v17 }
  0x66   :  { %607 = vmatmul.f32.vlgmr.msra.gmra.mxu0 %v2815_v18  ;;  %636 = vmatpush.msra.mxu1 %v2705_v32  ;;  %v764_v32 = vld [vmem:[%s4149_s4 + $0x40] sm:$0xff]  ;;  %v845_v59 = vand.u32 4294901760, %v844_v1 }
  0x67   :  { %789 = vmatpush.msrb.mxu0 %v2897_v45  ;;  %709 = vmatpush.msra.mxu2 %v542_v62  ;;  %v2990_v53 = vand.u32 4294901760, %v764_v32  ;;  %v762_v62 = vld [vmem:[%s4149_s4 + $0x30] sm:$0xff]  ;;  %v855_v36 = vand.u32 4294901760, %v2978_v58  ;;  %v851_v12 = vand.u32 4294901760, %v850_v28  ;;  %v785_v28 = vld [vmem:[%s4149_s4 + $0xe8] sm:$0xff] }
  0x68   :  { %746 = vmatpush.msra.mxu3 %v2735_v29  ;;  %638 = vmatpush.msra.mxu1 %v2735_v29  ;;  %v763_v29 = vld [vmem:[%s4149_s4 + $0x38] sm:$0xff] }
  0x69   :  { %791 = vmatpush.msrb.mxu0 %v2907_v34  ;;  %713 = vmatpush.msra.mxu2 %v548_v63  ;;  %v3001_v23 = vand.u32 4294901760, %v763_v29  ;;  %v3010_v63 = vsub.f32 %v765_v61, %v2974_v3  ;;  %v3026_v35 = vsub.f32 %v764_v32, %v2990_v53  ;;  %v856_v50 = vsub.f32 %v2978_v58, %v855_v36 }
  0x6a   :  { %748 = vmatpush.msra.mxu3 %v2751_v2  ;;  %715 = vmatmul.f32.vlgmr.msra.gmra.mxu2 %v2797_v9  ;;  %v3105_v32 = vsub.f32 %v759_v51, %v3069_v55  ;;  %v3137_v51 = vand.u32 4294901760, %v786_v16 }
  0x6b   :  { %793 = vmatpush.msrb.mxu0 %v2917_v40  ;;  %932 = vmatpush.msrb.mxu2 %v2920_v7  ;;  %v3032_v39 = vsub.f32 %v763_v29, %v3001_v23  ;;  %v4187_v18 = vand.u32 4294901760, %v3010_v63  ;;  %v4186_v30 = vand.u32 4294901760, %v3026_v35  ;;  %v857_v44 = vand.u32 4294901760, %v856_v50 }
  0x6c   :  { %640 = vmatpush.msra.mxu1 %v2751_v2  ;;  %750 = vmatpush.msra.mxu3 %v2770_v46  ;;  %v3014_v2 = vand.u32 4294901760, %v762_v62  ;;  %v3112_v29 = vand.u32 4294901760, %v787_v43  ;;  %v3135_v50 = vsub.f32 %v757_v33, %v3101_v42 }
  0x6d   :  { %752 = vmatmul.f32.vlgmr.msra.gmra.mxu3 %v2797_v9  ;;  %795 = vmatpush.msrb.mxu0 %v2930_v6  ;;  %v761_v9 = vld [vmem:[%s4149_s4 + $0x28] sm:$0xff]  ;;  %v4184_v11 = vand.u32 4294901760, %v3032_v39  ;;  %v868_v27 = vsub.f32 %v3010_v63, %v4187_v18  ;;  %v874_v54 = vsub.f32 %v3026_v35, %v4186_v30 }
  0x6e   :  { %935 = vmatpush.msrb.mxu2 %v2933_v24  ;;  %985 = vmatpush.msrb.mxu3 %v2897_v45  ;;  %v3041_v41 = vand.u32 4294901760, %v761_v9 }
  0x6f   :  { %642 = vmatpush.msra.mxu1 %v2770_v46  ;;  %797 = vmatpush.msrb.mxu0 %v2943_v60  ;;  %v760_v46 = vld [vmem:[%s4149_s4 + $0x20] sm:$0xff]  ;;  %v880_v48 = vsub.f32 %v3032_v39, %v4184_v11  ;;  %v869_v37 = vand.u32 4294901760, %v868_v27 }
  0x70   :  { %646 = vmatmul.f32.vlgmr.msra.gmra.mxu1 %v449_v20  ;;  %938 = vmatpush.msrb.mxu2 %v2947_v13  ;;  %v3047_v20 = vsub.f32 %v762_v62, %v3014_v2  ;;  %v3056_v52 = vand.u32 4294901760, %v760_v46  ;;  %v3072_v8 = vsub.f32 %v761_v9, %v3041_v41  ;;  %v875_v62 = vand.u32 4294901760, %v874_v54  ;;  %v783_v54 = vld [vmem:[%s4149_s4 + $0xd8] sm:$0xff] }
  0x71   :  { %834 = vmatpush.msrb.mxu1 %v833_v21  ;;  %987 = vmatpush.msrb.mxu3 %v2907_v34  ;;  %v3118_v21 = vand.u32 4294901760, %v756_v49  ;;  %v3122_v9 = vsub.f32 %v758_v31, %v3084_v56  ;;  %v3145_v31 = vsub.f32 %v787_v43, %v3112_v29 }
  0x72   :  { %799 = vmatpush.msrb.mxu0 %v2957_v19  ;;  %941 = vmatpush.msrb.mxu2 %v2961_v4  ;;  %v4182_v0 = vand.u32 4294901760, %v3047_v20  ;;  %v3087_v47 = vsub.f32 %v760_v46, %v3056_v52  ;;  %v4181_v61 = vand.u32 4294901760, %v3072_v8 }
  0x73   :  { %840 = vmatpush.msrb.mxu1 %v839_v26  ;;  %989 = vmatpush.msrb.mxu3 %v2917_v40  ;;  %v881_v26 = vand.u32 4294901760, %v880_v48  ;;  %v4183_v27 = vand.u32 4294901760, %v3122_v9  ;;  %v3153_v33 = vsub.f32 %v756_v49, %v3118_v21 }
  0x74   :  { %801 = vmatpush.msrb.mxu0 %v2974_v3  ;;  %944 = vmatpush.msrb.mxu2 %v2978_v58  ;;  %v886_v15 = vsub.f32 %v3047_v20, %v4182_v0  ;;  %v4179_v1 = vand.u32 4294901760, %v3087_v47  ;;  %v892_v46 = vsub.f32 %v3072_v8, %v4181_v61 }
  0x75   :  { %846 = vmatpush.msrb.mxu1 %v845_v59  ;;  %991 = vmatpush.msrb.mxu3 %v2930_v6  ;;  %v4180_v59 = vand.u32 4294901760, %v3105_v32 }
  0x76   :  { %803 = vmatpush.msrb.mxu0 %v2990_v53  ;;  %947 = vmatpush.msrb.mxu2 %v2994_v22  ;;  %v887_v57 = vand.u32 4294901760, %v886_v15  ;;  %v893_v48 = vand.u32 4294901760, %v892_v46  ;;  %v3170_v15 = vsub.f32 %v786_v16, %v3137_v51  ;;  %v910_v16 = vsub.f32 %v3122_v9, %v4183_v27 }
  0x77   :  { %852 = vmatpush.msrb.mxu1 %v851_v12  ;;  %993 = vmatpush.msrb.mxu3 %v2943_v60  ;;  %v784_v12 = vld [vmem:[%s4149_s4 + $0xe0] sm:$0xff]  ;;  %v904_v49 = vsub.f32 %v3105_v32, %v4180_v59  ;;  %v4190_v59 = vand.u32 4294901760, %v3153_v33 }
  0x78   :  { %805 = vmatpush.msrb.mxu0 %v3001_v23  ;;  %950 = vmatpush.msrb.mxu2 %v3010_v63  ;;  %v3162_v43 = vand.u32 4294901760, %v784_v12  ;;  %v4191_v27 = vand.u32 4294901760, %v3170_v15 }
  0x79   :  { %858 = vmatpush.msrb.mxu1 %v857_v44  ;;  %995 = vmatpush.msrb.mxu3 %v2957_v19  ;;  %v898_v44 = vsub.f32 %v3087_v47, %v4179_v1  ;;  %v3175_v1 = vand.u32 4294901760, %v783_v54  ;;  %v922_v30 = vsub.f32 %v3153_v33, %v4190_v59 }
  0x7a   :  { %807 = vmatpush.msrb.mxu0 %v3014_v2  ;;  %953 = vmatpush.msrb.mxu2 %v3026_v35  ;;  %v3191_v0 = vsub.f32 %v784_v12, %v3162_v43 }
  0x7b   :  { %864 = vmatpush.msrb.mxu1 %v863_v38  ;;  %997 = vmatpush.msrb.mxu3 %v2974_v3  ;;  %v3155_v38 = vand.u32 4294901760, %v785_v28  ;;  %v899_v46 = vand.u32 4294901760, %v898_v44  ;;  %v905_v44 = vand.u32 4294901760, %v904_v49  ;;  %v780_v49 = vld [vmem:[%s4149_s4 + $0xc0] sm:$0xff] }
  0x7c   :  { %809 = vmatpush.msrb.mxu0 %v3041_v41  ;;  %956 = vmatpush.msrb.mxu2 %v3032_v39  ;;  %v3235_v7 = vand.u32 4294901760, %v780_v49 }
  0x7d   :  { %870 = vmatpush.msrb.mxu1 %v869_v37  ;;  %999 = vmatpush.msrb.mxu3 %v2990_v53  ;;  %v4185_v37 = vand.u32 4294901760, %v3135_v50  ;;  %v3186_v61 = vsub.f32 %v785_v28, %v3155_v38 }
  0x7e   :  { %811 = vmatpush.msrb.mxu0 %v3056_v52  ;;  %959 = vmatpush.msrb.mxu2 %v3047_v20 }
  0x7f   :  { %876 = vmatpush.msrb.mxu1 %v875_v62  ;;  %1001 = vmatpush.msrb.mxu3 %v3001_v23  ;;  %v4189_v62 = vand.u32 4294901760, %v3145_v31  ;;  %v916_v28 = vsub.f32 %v3135_v50, %v4185_v37  ;;  %v911_v37 = vand.u32 4294901760, %v910_v16  ;;  %v4192_v18 = vand.u32 4294901760, %v3186_v61 }
  0x80   :  { %813 = vmatpush.msrb.mxu0 %v3069_v55  ;;  %962 = vmatpush.msrb.mxu2 %v3072_v8 }
  0x81   :  { %882 = vmatpush.msrb.mxu1 %v881_v26  ;;  %1003 = vmatpush.msrb.mxu3 %v3014_v2  ;;  %v782_v26 = vld [vmem:[%s4149_s4 + $0xd0] sm:$0xff]  ;;  %v1173_v12 = vsub.f32 %v3145_v31, %v4189_v62  ;;  %v917_v16 = vand.u32 4294901760, %v916_v28  ;;  %v1179_v62 = vsub.f32 %v3170_v15, %v4191_v27  ;;  %v923_v27 = vand.u32 4294901760, %v922_v30  ;;  %v777_v30 = vld [vmem:[%s4149_s4 + $0xa8] sm:$0xff] }
  0x82   :  { %815 = vmatpush.msrb.mxu0 %v3084_v56  ;;  %965 = vmatpush.msrb.mxu2 %v3087_v47  ;;  %v3201_v11 = vand.u32 4294901760, %v782_v26  ;;  %v778_v28 = vld [vmem:[%s4149_s4 + $0xb0] sm:$0xff]  ;;  %v3282_v4 = vand.u32 4294901760, %v777_v30 }
  0x83   :  { %888 = vmatpush.msrb.mxu1 %v887_v57  ;;  %1005 = vmatpush.msrb.mxu3 %v3041_v41  ;;  %v781_v57 = vld [vmem:[%s4149_s4 + $0xc8] sm:$0xff]  ;;  %v3267_v13 = vand.u32 4294901760, %v778_v28 }
  0x84   :  { %817 = vmatpush.msrb.mxu0 %v3101_v42  ;;  %968 = vmatpush.msrb.mxu2 %v3105_v32  ;;  %v3219_v10 = vand.u32 4294901760, %v781_v57  ;;  %v3233_v59 = vsub.f32 %v782_v26, %v3201_v11  ;;  %v1185_v26 = vsub.f32 %v3186_v61, %v4192_v18  ;;  %v3265_v18 = vsub.f32 %v780_v49, %v3235_v7 }
  0x85   :  { %894 = vmatpush.msrb.mxu1 %v893_v48  ;;  %1007 = vmatpush.msrb.mxu3 %v3056_v52  ;;  %v3209_v48 = vsub.f32 %v783_v54, %v3175_v1  ;;  %v4193_v54 = vand.u32 4294901760, %v3191_v0 }
  0x86   :  { %819 = vmatpush.msrb.mxu0 %v3118_v21  ;;  %971 = vmatpush.msrb.mxu2 %v3122_v9  ;;  %v3249_v24 = vsub.f32 %v781_v57, %v3219_v10  ;;  %v1180_v57 = vand.u32 4294901760, %v1179_v62  ;;  %v776_v62 = vld [vmem:[%s4149_s4 + $0xa0] sm:$0xff] }
  0x87   :  { %900 = vmatpush.msrb.mxu1 %v899_v46  ;;  %1009 = vmatpush.msrb.mxu3 %v3069_v55  ;;  %v779_v46 = vld [vmem:[%s4149_s4 + $0xb8] sm:$0xff]  ;;  %v3298_v58 = vand.u32 4294901760, %v776_v62 }
  0x88   :  { %1026 = vmatpush.msra.mxu0 %v831_v25  ;;  %974 = vmatpush.msrb.mxu2 %v3135_v50  ;;  %v1174_v25 = vand.u32 4294901760, %v1173_v12  ;;  %v4196_v12 = vand.u32 4294901760, %v3233_v59  ;;  %v4195_v49 = vand.u32 4294901760, %v3249_v24 }
  0x89   :  { %906 = vmatpush.msrb.mxu1 %v905_v44  ;;  %1011 = vmatpush.msrb.mxu3 %v3084_v56  ;;  %v4194_v44 = vand.u32 4294901760, %v3209_v48 }
  0x8a   :  { %1030 = vmatpush.msra.mxu0 %v837_v5  ;;  %977 = vmatpush.msrb.mxu2 %v3153_v33  ;;  %v3251_v5 = vand.u32 4294901760, %v779_v46 }
  0x8b   :  { %912 = vmatpush.msrb.mxu1 %v911_v37  ;;  %1013 = vmatpush.msrb.mxu3 %v3101_v42  ;;  %v1191_v37 = vsub.f32 %v3191_v0, %v4193_v54 }
  0x8c   :  { %1034 = vmatpush.msra.mxu0 %v843_v14  ;;  %1130 = vmatpush.msra.mxu2 %v3112_v29  ;;  %v1197_v14 = vsub.f32 %v3209_v48, %v4194_v44  ;;  %v3280_v54 = vsub.f32 %v779_v46, %v3251_v5  ;;  %v775_v44 = vld [vmem:[%s4149_s4 + $0x98] sm:$0xff]  ;;  %v4197_v46 = vand.u32 4294901760, %v3265_v18 }
  0x8d   :  { %918 = vmatpush.msrb.mxu1 %v917_v16  ;;  %1015 = vmatpush.msrb.mxu3 %v3118_v21  ;;  %v1186_v16 = vand.u32 4294901760, %v1185_v26  ;;  %v1209_v26 = vsub.f32 %v3249_v24, %v4195_v49 }
  0x8e   :  { %1038 = vmatpush.msra.mxu0 %v849_v17  ;;  %1132 = vmatpush.msra.mxu2 %v3137_v51  ;;  %v1192_v17 = vand.u32 4294901760, %v1191_v37  ;;  %v1220_v37 = vand.u32 4294901760, %v3280_v54 }
  0x8f   :  { %1175 = vmatpush.msra.mxu3 %v1174_v25  ;;  %924 = vmatpush.msrb.mxu1 %v923_v27  ;;  %v1203_v27 = vsub.f32 %v3233_v59, %v4196_v12  ;;  %v3296_v25 = vsub.f32 %v778_v28, %v3267_v13  ;;  %v3309_v28 = vsub.f32 %v777_v30, %v3282_v4 }
  0x90   :  { %1042 = vmatpush.msra.mxu0 %v855_v36  ;;  %1134 = vmatpush.msra.mxu2 %v3155_v38  ;;  %v1198_v36 = vand.u32 4294901760, %v1197_v14  ;;  %v1215_v30 = vsub.f32 %v3265_v18, %v4197_v46  ;;  %v3328_v12 = vsub.f32 %v776_v62, %v3298_v58  ;;  %v1221_v62 = vsub.f32 %v3280_v54, %v1220_v37 }
  0x91   :  { %1093 = vmatpush.msra.mxu1 %v2897_v45  ;;  %1181 = vmatpush.msra.mxu3 %v1180_v57  ;;  %v4268_v45 = vand.u32 4294901760, %v2994_v22  ;;  %v3311_v57 = vand.u32 4294901760, %v775_v44  ;;  %v774_v22 = vld [vmem:[%s4149_s4 + $0x90] sm:$0xff]  ;;  %v4198_v49 = vand.u32 4294901760, %v3296_v25 }
  0x92   :  { %1136 = vmatpush.msra.mxu2 %v3162_v43 }
  0x93   :  { %1046 = vmatpush.msra.mxu0 %v4268_v45  ;;  %1095 = vmatpush.msra.mxu1 %v2907_v34  ;;  %v4269_v34 = vld [vmem:[#allocation9_spill] sm:$0xff]  ;;  %v1204_v45 = vand.u32 4294901760, %v1203_v27  ;;  %v1232_v27 = vand.u32 4294901760, %v3309_v28  ;;  %v3344_v46 = vsub.f32 %v775_v44, %v3311_v57  ;;  %v1216_v44 = vand.u32 4294901760, %v1215_v30 }
  0x94   :  { %1187 = vmatpush.msra.mxu3 %v1186_v16  ;;  %v3317_v14 = vand.u32 4294901760, %v4269_v34  ;;  %v4271_v16 = vand.u32 4294901760, %v3010_v63  ;;  %1138 = vmatpush.msra.mxu2 %v3175_v1  ;;  %v773_v63 = vld [vmem:[%s4149_s4 + $0x88] sm:$0xff] }
  0x95   :  { %1097 = vmatpush.msra.mxu1 %v2917_v40  ;;  %v3336_v40 = vand.u32 4294901760, %v774_v22  ;;  %v1244_v30 = vand.u32 4294901760, %v3344_v46 }
  0x96   :  { %4270 = vst [vmem:[#allocation5_spill] sm:$0xff] %v3317_v14  ;;  %1050 = vmatpush.msra.mxu0 %v4271_v16  ;;  %1193 = vmatpush.msra.mxu3 %v1192_v17  ;;  %v4272_v16 = vand.u32 4294901760, %v3026_v35  ;;  %v1210_v17 = vand.u32 4294901760, %v1209_v26  ;;  %v4273_v35 = vand.u32 4294901760, %v3032_v39  ;;  %v772_v26 = vld [vmem:[%s4149_s4 + $0x80] sm:$0xff]  ;;  %v1227_v39 = vsub.f32 %v3296_v25, %v4198_v49 }
  0x97   :  { %1099 = vmatpush.msra.mxu1 %v2930_v6  ;;  %1140 = vmatpush.msra.mxu2 %v3201_v11  ;;  %v3351_v6 = vsub.f32 %v4269_v34, %v3317_v14  ;;  %v3367_v34 = vsub.f32 %v774_v22, %v3336_v40  ;;  %v3374_v49 = vand.u32 4294901760, %v772_v26 }
  0x98   :  { %1054 = vmatpush.msra.mxu0 %v4272_v16  ;;  %1199 = vmatpush.msra.mxu3 %v1198_v36  ;;  %v3353_v36 = vand.u32 4294901760, %v773_v63  ;;  %v4274_v16 = vand.u32 4294901760, %v3047_v20  ;;  %v4275_v20 = vand.u32 4294901760, %v3072_v8 }
  0x99   :  { %1101 = vmatpush.msra.mxu1 %v2943_v60  ;;  %1142 = vmatpush.msra.mxu2 %v3219_v10  ;;  %v1238_v60 = vand.u32 4294901760, %v3328_v12 }
  0x9a   :  { %1058 = vmatpush.msra.mxu0 %v4273_v35  ;;  %1205 = vmatpush.msra.mxu3 %v1204_v45  ;;  %v1222_v35 = vand.u32 4294901760, %v1221_v62  ;;  %v1233_v45 = vsub.f32 %v3309_v28, %v1232_v27  ;;  %v3383_v22 = vsub.f32 %v773_v63, %v3353_v36  ;;  %v1245_v63 = vsub.f32 %v3344_v46, %v1244_v30 }
  0x9b   :  { %1103 = vmatpush.msra.mxu1 %v2957_v19  ;;  %1144 = vmatpush.msra.mxu2 %v3235_v7  ;;  %v3380_v19 = vand.u32 4294901760, %v3351_v6  ;;  %v1239_v62 = vsub.f32 %v3328_v12, %v1238_v60 }
  0x9c   :  { %1062 = vmatpush.msra.mxu0 %v4274_v16  ;;  %1211 = vmatpush.msra.mxu3 %v1210_v17  ;;  %v1228_v17 = vand.u32 4294901760, %v1227_v39  ;;  %v4277_v16 = vand.u32 4294901760, %v3087_v47  ;;  %v1234_v8 = vand.u32 4294901760, %v1233_v45  ;;  %v4278_v39 = vld [vmem:[#allocation10_spill] sm:$0xff]  ;;  %v4280_v47 = vand.u32 4294901760, %v3105_v32 }
  0x9d   :  { %1105 = vmatpush.msra.mxu1 %v2974_v3  ;;  %4276 = vst [vmem:[#allocation6_spill] sm:$0xff] %v3380_v19  ;;  %1146 = vmatpush.msra.mxu2 %v3251_v5  ;;  %v1250_v3 = vand.u32 4294901760, %v3367_v34  ;;  %v1240_v45 = vand.u32 4294901760, %v1239_v62 }
  0x9e   :  { %1066 = vmatpush.msra.mxu0 %v4275_v20  ;;  %1217 = vmatpush.msra.mxu3 %v1216_v44  ;;  %v3398_v44 = vsub.f32 %v772_v26, %v3374_v49  ;;  %v3401_v20 = vand.u32 4294901760, %v4278_v39  ;;  %v4281_v26 = vand.u32 4294901760, %v3122_v9  ;;  %v4282_v39 = vand.u32 4294901760, %v3135_v50  ;;  %v2243_v9 = vld [vmem:[%s4146_s1 + $0x8] sm:$0xff] }
  0x9f   :  { %1107 = vmatpush.msra.mxu1 %v2990_v53  ;;  %1148 = vmatpush.msra.mxu2 %v3267_v13  ;;  %v823_v53 = vsub.f32 %v3351_v6, %v3380_v19  ;;  %v1251_v32 = vsub.f32 %v3367_v34, %v1250_v3  ;;  %v4284_v50 = vand.u32 4294901760, %v3153_v33  ;;  %v4286_v33 = vand.u32 4294901760, %v3145_v31 }
  0xa0   :  { %1070 = vmatpush.msra.mxu0 %v4277_v16  ;;  %1223 = vmatpush.msra.mxu3 %v1222_v35  ;;  %4279 = vst [vmem:[#allocation8_spill] sm:$0xff] %v3401_v20  ;;  %v1256_v35 = vand.u32 4294901760, %v3383_v22  ;;  %v1262_v16 = vand.u32 4294901760, %v3398_v44  ;;  %v3430_v62 = vsub.f32 %v2243_v9, %v3401_v20 }
  0xa1   :  { %1109 = vmatpush.msra.mxu1 %v3001_v23  ;;  %1150 = vmatpush.msra.mxu2 %v3282_v4  ;;  %v1246_v23 = vand.u32 4294901760, %v1245_v63 }
  0xa2   :  { %1074 = vmatpush.msra.mxu0 %v4280_v47  ;;  %1229 = vmatpush.msra.mxu3 %v1228_v17  ;;  %v3421_v17 = vand.u32 4294901760, %v823_v53  ;;  %4283 = vst [vmem:[#allocation7_spill] sm:$0xff] %v3430_v62  ;;  %v3443_v47 = vand.u32 4294901760, %v3430_v62 }
  0xa3   :  { %1111 = vmatpush.msra.mxu1 %v3014_v2  ;;  %1152 = vmatpush.msra.mxu2 %v3298_v58  ;;  %v1257_v2 = vsub.f32 %v3383_v22, %v1256_v35 }
  0xa4   :  { %1078 = vmatpush.msra.mxu0 %v4281_v26  ;;  %1235 = vmatpush.msra.mxu3 %v1234_v8  ;;  %v1263_v8 = vsub.f32 %v3398_v44, %v1262_v16  ;;  %4285 = vst [vmem:[#allocation9_spill] sm:$0xff] %v3443_v47 }
  0xa5   :  { %1113 = vmatpush.msra.mxu1 %v3041_v41  ;;  %1154 = vmatpush.msra.mxu2 %v3311_v57  ;;  %v1252_v41 = vand.u32 4294901760, %v1251_v32  ;;  %v1258_v63 = vand.u32 4294901760, %v1257_v2 }
  0xa6   :  { %1082 = vmatpush.msra.mxu0 %v4282_v39  ;;  %1241 = vmatpush.msra.mxu3 %v1240_v45 }
  0xa7   :  { %1115 = vmatpush.msra.mxu1 %v3056_v52  ;;  %1156 = vmatpush.msra.mxu2 %v3336_v40  ;;  %v1264_v52 = vand.u32 4294901760, %v1263_v8  ;;  %v1476_v8 = vld [vmem:[%s4150_s5 + $0x30] sm:$0xff] }
  0xa8   :  { %1086 = vmatpush.msra.mxu0 %v4284_v50  ;;  %1247 = vmatpush.msra.mxu3 %v1246_v23  ;;  %v1477_v23 = vld [vmem:[%s4150_s5 + $0x38] sm:$0xff] }
  0xa9   :  { %825 = vmatmul.f32.vlgmr.msrb.gmra.mxu0 %v3421_v17  ;;  %1117 = vmatpush.msra.mxu1 %v3069_v55  ;;  %v1164_v55 = vsub.f32 %v3430_v62, %v3443_v47 }
  0xaa   :  { %1273 = vmatpush.msrb.mxu0 %v3145_v31  ;;  %1158 = vmatpush.msra.mxu2 %v3353_v36  ;;  %v4290_v31 = vand.u32 4294901760, %v3191_v0 }
  0xab   :  { %1253 = vmatpush.msra.mxu3 %v1252_v41  ;;  %980 = vmatmul.f32.vlgmr.msrb.gmra.mxu2 %v3351_v6  ;;  %v3462_v53 = vand.u32 4294901760, %v1164_v55 }
  0xac   :  { %1276 = vmatpush.msrb.mxu0 %v3170_v15  ;;  %1119 = vmatpush.msra.mxu1 %v3084_v56  ;;  %v4287_v56 = vand.u32 4294901760, %v3170_v15  ;;  %v1482_v15 = vld [vmem:[%s4150_s5 + $0x60] sm:$0xff] }
  0xad   :  { %1160 = vmatpush.msra.mxu2 %v3374_v49  ;;  %1259 = vmatpush.msra.mxu3 %v1258_v63  ;;  %4288 = vst [vmem:[#allocation10_spill] sm:$0xff] %v3462_v53 }
  0xae   :  { %1019 = vmatmul.f32.vlgmr.msrb.gmra.mxu3 %v3380_v19  ;;  %1279 = vmatpush.msrb.mxu0 %v3186_v61 }
  0xaf   :  { %1367 = vmatpush.msrb.mxu2 %v4286_v33  ;;  %1121 = vmatpush.msra.mxu1 %v3101_v42  ;;  %v4289_v42 = vand.u32 4294901760, %v3186_v61  ;;  %v4291_v61 = vand.u32 4294901760, %v3209_v48 }
  0xb0   :  { %1265 = vmatpush.msra.mxu3 %v1264_v52  ;;  %926 = vmatmul.f32.vlgmr.msrb.gmra.mxu1 %v3317_v14  ;;  %v3620_v52 = vand.u32 4294901760, %v1477_v23 }
  0xb1   :  { %1282 = vmatpush.msrb.mxu0 %v3191_v0  ;;  %1371 = vmatpush.msrb.mxu2 %v4287_v56  ;;  %v4292_v0 = vand.u32 4294901760, %v3233_v59 }
  0xb2   :  { %1434 = vmatpush.msrb.mxu3 %v3112_v29  ;;  %1123 = vmatpush.msra.mxu1 %v3118_v21  ;;  %v4294_v21 = vand.u32 4294901760, %v3265_v18 }
  0xb3   :  { %1285 = vmatpush.msrb.mxu0 %v3209_v48  ;;  %1375 = vmatpush.msrb.mxu2 %v4289_v42 }
  0xb4   :  { %1326 = vmatpush.msrb.mxu1 %v3112_v29  ;;  %1436 = vmatpush.msrb.mxu3 %v3137_v51  ;;  %v4293_v29 = vand.u32 4294901760, %v3249_v24 }
  0xb5   :  { %1166 = vmatmul.f32.vlgmr.msra.gmra.mxu2 %v3462_v53  ;;  %1288 = vmatpush.msrb.mxu0 %v3233_v59  ;;  %v1485_v59 = vld [vmem:[%s4150_s5 + $0x78] sm:$0xff] }
  0xb6   :  { %1328 = vmatpush.msrb.mxu1 %v3137_v51  ;;  %1379 = vmatpush.msrb.mxu2 %v4290_v31  ;;  %v3633_v31 = vand.u32 4294901760, %v1476_v8 }
  0xb7   :  { %1438 = vmatpush.msrb.mxu3 %v3155_v38  ;;  %1088 = vmatmul.f32.vlgmr.msra.gmra.mxu0 %v3317_v14 }
  0xb8   :  { %1267 = vmatmul.f32.vlgmr.msra.gmra.mxu3 %v3401_v20  ;;  %1291 = vmatpush.msrb.mxu0 %v3249_v24 }
  0xb9   :  { %1330 = vmatpush.msrb.mxu1 %v3155_v38  ;;  %1383 = vmatpush.msrb.mxu2 %v4291_v61  ;;  %v1483_v38 = vld [vmem:[%s4150_s5 + $0x68] sm:$0xff] }
  0xba   :  { %1440 = vmatpush.msrb.mxu3 %v3162_v43  ;;  %1125 = vmatmul.f32.vlgmr.msra.gmra.mxu1 %v3317_v14 }
  0xbb   :  { %1294 = vmatpush.msrb.mxu0 %v3265_v18  ;;  %1332 = vmatpush.msrb.mxu1 %v3162_v43  ;;  %v1484_v18 = vld [vmem:[%s4150_s5 + $0x70] sm:$0xff] }
  0xbc   :  { %1387 = vmatpush.msrb.mxu2 %v4292_v0  ;;  %1442 = vmatpush.msrb.mxu3 %v3175_v1  ;;  %v3520_v51 = vand.u32 4294901760, %v1484_v18  ;;  %v1475_v0 = vld [vmem:[%s4150_s5 + $0x28] sm:$0xff] }
  0xbd   :  { %1297 = vmatpush.msrb.mxu0 %v3280_v54  ;;  %1334 = vmatpush.msrb.mxu1 %v3175_v1  ;;  %v4295_v1 = vand.u32 4294901760, %v3296_v25  ;;  %v3539_v54 = vand.u32 4294901760, %v1483_v38 }
  0xbe   :  { %1391 = vmatpush.msrb.mxu2 %v4293_v29  ;;  %1444 = vmatpush.msrb.mxu3 %v3201_v11 }
  0xbf   :  { %1300 = vmatpush.msrb.mxu0 %v3296_v25  ;;  %1336 = vmatpush.msrb.mxu1 %v3201_v11  ;;  %v3513_v11 = vand.u32 4294901760, %v1485_v59 }
  0xc0   :  { %1395 = vmatpush.msrb.mxu2 %v4294_v21  ;;  %1446 = vmatpush.msrb.mxu3 %v3219_v10 }
  0xc1   :  { %1303 = vmatpush.msrb.mxu0 %v3309_v28  ;;  %1338 = vmatpush.msrb.mxu1 %v3219_v10  ;;  %v112_v10 = vpop.f32.mrf.mxu0  ;;  %v3531_v43 = vsub.f32 %v1485_v59, %v3513_v11 }
  0xc2   :  { %1399 = vmatpush.msrb.mxu2 %v1220_v37  ;;  %1448 = vmatpush.msrb.mxu3 %v3235_v7  ;;  %v1480_v37 = vld [vmem:[%s4150_s5 + $0x50] sm:$0xff] }
  0xc3   :  { %1306 = vmatpush.msrb.mxu0 %v3328_v12  ;;  %1340 = vmatpush.msrb.mxu1 %v3235_v7  ;;  %v3552_v12 = vand.u32 4294901760, %v1482_v15 }
  0xc4   :  { %1403 = vmatpush.msrb.mxu2 %v4295_v1  ;;  %1450 = vmatpush.msrb.mxu3 %v3251_v5  ;;  %v3652_v1 = vsub.f32 %v1477_v23, %v3620_v52 }
  0xc5   :  { %1309 = vmatpush.msrb.mxu0 %v3344_v46  ;;  %1342 = vmatpush.msrb.mxu1 %v3251_v5  ;;  %v3544_v5 = vsub.f32 %v1484_v18, %v3520_v51 }
  0xc6   :  { %1407 = vmatpush.msrb.mxu2 %v1232_v27  ;;  %1452 = vmatpush.msrb.mxu3 %v3267_v13  ;;  %v213_v48 = vpop.f32.mrf.mxu1  ;;  %v3566_v27 = vsub.f32 %v1483_v38, %v3539_v54 }
  0xc7   :  { %1312 = vmatpush.msrb.mxu0 %v3367_v34  ;;  %1344 = vmatpush.msrb.mxu1 %v3267_v13  ;;  %v214_v7 = vadd.f32 %v213_v48, %v112_v10  ;;  %v1481_v13 = vld [vmem:[%s4150_s5 + $0x58] sm:$0xff]  ;;  %v3577_v34 = vand.u32 4294901760, %v1480_v37 }
  0xc8   :  { %1411 = vmatpush.msrb.mxu2 %v1238_v60  ;;  %1454 = vmatpush.msrb.mxu3 %v3282_v4  ;;  %v267_v24 = vpop.f32.mrf.mxu2  ;;  %v306_v28 = vpop.f32.mrf.mxu3  ;;  %v3563_v46 = vand.u32 4294901760, %v1481_v13  ;;  %v4208_v32 = vand.u32 4294901760, %v3566_v27 }
  0xc9   :  { %1315 = vmatpush.msrb.mxu0 %v3383_v22  ;;  %1346 = vmatpush.msrb.mxu1 %v3282_v4  ;;  %v268_v25 = vadd.f32 %v267_v24, %v214_v7  ;;  %v4211_v4 = vand.u32 4294901760, %v3531_v43  ;;  %v1478_v22 = vld [vmem:[%s4150_s5 + $0x40] sm:$0xff]  ;;  %v3613_v9 = vsub.f32 %v1480_v37, %v3577_v34  ;;  %v3667_v7 = vsub.f32 %v1476_v8, %v3633_v31  ;;  %v1473_v24 = vld [vmem:[%s4150_s5 + $0x18] sm:$0xff] }
  0xca   :  { %1415 = vmatpush.msrb.mxu2 %v1244_v30  ;;  %1456 = vmatpush.msrb.mxu3 %v3298_v58  ;;  %v1479_v30 = vld [vmem:[%s4150_s5 + $0x48] sm:$0xff]  ;;  %v3609_v39 = vand.u32 4294901760, %v1478_v22  ;;  %v1558_v55 = vsub.f32 %v3566_v27, %v4208_v32 }
  0xcb   :  { %1318 = vmatpush.msrb.mxu0 %v3398_v44  ;;  %1348 = vmatpush.msrb.mxu1 %v3298_v58  ;;  %v307_v60 = vadd.f32 %v306_v28, %v268_v25  ;;  %v4210_v58 = vand.u32 4294901760, %v3544_v5  ;;  %v4204_v21 = vand.u32 4294901760, %v3613_v9  ;;  %v4199_v23 = vand.u32 4294901760, %v3667_v7 }
  0xcc   :  { %1419 = vmatpush.msrb.mxu2 %v1250_v3  ;;  %1458 = vmatpush.msrb.mxu3 %v3311_v57  ;;  %v3580_v3 = vsub.f32 %v1482_v15, %v3552_v12  ;;  %v3645_v59 = vsub.f32 %v1478_v22, %v3609_v39  ;;  %v1559_v10 = vand.u32 4294901760, %v1558_v55  ;;  %v3661_v15 = vand.u32 4294901760, %v1475_v0 }
  0xcd   :  { %1321 = vmatmul.f32.vlgmr.msrb.gmra.mxu0 %v3430_v62  ;;  %1350 = vmatpush.msrb.mxu1 %v3311_v57  ;;  %v375_v45 = vpop.f32.mrf.mxu0  ;;  %v1546_v57 = vsub.f32 %v3531_v43, %v4211_v4  ;;  %v1552_v44 = vsub.f32 %v3544_v5, %v4210_v58  ;;  %v1576_v25 = vsub.f32 %v3613_v9, %v4204_v21 }
  0xce   :  { %1503 = vmatpush.msra.mxu0 %v3513_v11  ;;  %1423 = vmatpush.msrb.mxu2 %v1256_v35  ;;  %v376_v26 = vadd.f32 %v375_v45, %v307_v60  ;;  %v3593_v35 = vand.u32 4294901760, %v1479_v30  ;;  %v4207_v2 = vand.u32 4294901760, %v3580_v3  ;;  %v4201_v28 = vand.u32 4294901760, %v3645_v59 }
  0xcf   :  { %1460 = vmatpush.msrb.mxu3 %v3336_v40  ;;  %1352 = vmatpush.msrb.mxu1 %v3336_v40  ;;  %v3597_v40 = vsub.f32 %v1481_v13, %v3563_v46  ;;  %v1547_v63 = vand.u32 4294901760, %v1546_v57  ;;  %v4200_v60 = vand.u32 4294901760, %v3652_v1  ;;  %v3692_v22 = vsub.f32 %v1475_v0, %v3661_v15 }
  0xd0   :  { %1505 = vmatpush.msra.mxu0 %v3520_v51  ;;  %1427 = vmatpush.msrb.mxu2 %v1262_v16  ;;  %v412_v16 = vpop.f32.mrf.mxu1  ;;  %v3629_v56 = vsub.f32 %v1479_v30, %v3593_v35  ;;  %v1564_v29 = vsub.f32 %v3580_v3, %v4207_v2  ;;  %v1472_v30 = vld [vmem:[%s4150_s5 + $0x10] sm:$0xff] }
  0xd1   :  { %1462 = vmatpush.msrb.mxu3 %v3353_v36  ;;  %1429 = vmatmul.f32.vlgmr.msrb.gmra.mxu2 %v3401_v20  ;;  %v413_v50 = vadd.f32 %v412_v16, %v376_v26  ;;  %v453_v41 = vpop.f32.mrf.mxu2  ;;  %v4206_v33 = vand.u32 4294901760, %v3597_v40  ;;  %v3689_v26 = vand.u32 4294901760, %v1473_v24  ;;  %v1577_v16 = vand.u32 4294901760, %v1576_v25 }
  0xd2   :  { %1507 = vmatpush.msra.mxu0 %v3539_v54  ;;  %1646 = vmatpush.msra.mxu2 %v3531_v43  ;;  %v4203_v48 = vand.u32 4294901760, %v3629_v56  ;;  %v1565_v13 = vand.u32 4294901760, %v1564_v29  ;;  %v1594_v55 = vsub.f32 %v3652_v1, %v4200_v60  ;;  %v4202_v0 = vand.u32 4294901760, %v3692_v22 }
  0xd3   :  { %1354 = vmatpush.msrb.mxu1 %v3353_v36  ;;  %1464 = vmatpush.msrb.mxu3 %v3374_v49  ;;  %v454_v42 = vadd.f32 %v453_v41, %v413_v50  ;;  %v1553_v36 = vand.u32 4294901760, %v1552_v44  ;;  %v1570_v38 = vsub.f32 %v3597_v40, %v4206_v33  ;;  %v1471_v44 = vld [vmem:[%s4150_s5 + $0x8] sm:$0xff]  ;;  %v1588_v50 = vsub.f32 %v3645_v59, %v4201_v28 }
  0xd4   :  { %1466 = vmatmul.f32.vlgmr.msrb.gmra.mxu3 %v3401_v20  ;;  %1509 = vmatpush.msra.mxu0 %v3552_v12  ;;  %v554_v61 = vpop.f32.mrf.mxu3  ;;  %v1582_v57 = vsub.f32 %v3629_v56, %v4203_v48  ;;  %v3704_v41 = vand.u32 4294901760, %v1472_v30  ;;  %v3725_v29 = vsub.f32 %v1473_v24, %v3689_v26 }
  0xd5   :  { %1649 = vmatpush.msra.mxu2 %v3544_v5  ;;  %1699 = vmatpush.msra.mxu3 %v3513_v11  ;;  %v3647_v18 = vadd.f32 %v554_v61, %v454_v42  ;;  %v1571_v45 = vand.u32 4294901760, %v1570_v38  ;;  %v1470_v42 = vld [vmem:[%s4150_s5] sm:$0xff]  ;;  %v3721_v61 = vand.u32 4294901760, %v1471_v44  ;;  %v1500_v38 = vld [vmem:[%s4150_s5 + $0xf0] sm:$0xff] }
  0xd6   :  { %1356 = vmatpush.msrb.mxu1 %v3374_v49  ;;  %1511 = vmatpush.msra.mxu0 %v3563_v46  ;;  %v1474_v49 = vld [vmem:[%s4150_s5 + $0x20] sm:$0xff]  ;;  %4296 = vst [vmem:[#allocation11_spill] sm:$0xff] %v3704_v41  ;;  %v3738_v24 = vand.u32 4294901760, %v1470_v42  ;;  %v3757_v60 = vand.u32 4294901760, %v1500_v38 }
  0xd7   :  { %1360 = vmatmul.f32.vlgmr.msrb.gmra.mxu1 %v3443_v47  ;;  %1652 = vmatpush.msra.mxu2 %v3566_v27  ;;  %v3676_v37 = vand.u32 4294901760, %v1474_v49 }
  0xd8   :  { %1548 = vmatpush.msra.mxu1 %v1547_v63  ;;  %1701 = vmatpush.msra.mxu3 %v3520_v51  ;;  %v1501_v63 = vld [vmem:[%s4150_s5 + $0xf8] sm:$0xff]  ;;  %v3773_v48 = vsub.f32 %v1470_v42, %v3738_v24  ;;  %v3790_v33 = vsub.f32 %v1500_v38, %v3757_v60 }
  0xd9   :  { %1513 = vmatpush.msra.mxu0 %v3577_v34  ;;  %1655 = vmatpush.msra.mxu2 %v3580_v3  ;;  %v3707_v8 = vsub.f32 %v1474_v49, %v3676_v37  ;;  %v1600_v49 = vsub.f32 %v3667_v7, %v4199_v23  ;;  %v1499_v23 = vld [vmem:[%s4150_s5 + $0xe8] sm:$0xff] }
  0xda   :  { %1554 = vmatpush.msra.mxu1 %v1553_v36  ;;  %1703 = vmatpush.msra.mxu3 %v3539_v54  ;;  %v1583_v36 = vand.u32 4294901760, %v1582_v57  ;;  %v1595_v57 = vand.u32 4294901760, %v1594_v55  ;;  %v1498_v55 = vld [vmem:[%s4150_s5 + $0xe0] sm:$0xff]  ;;  %v3775_v21 = vand.u32 4294901760, %v1499_v23  ;;  %v4299_v62 = vand.u32 4294901760, %v3773_v48 }
  0xdb   :  { %1515 = vmatpush.msra.mxu0 %v3593_v35  ;;  %1658 = vmatpush.msra.mxu2 %v3597_v40  ;;  %v4205_v25 = vand.u32 4294901760, %v3707_v8 }
  0xdc   :  { %1560 = vmatpush.msra.mxu1 %v1559_v10  ;;  %1705 = vmatpush.msra.mxu3 %v3552_v12  ;;  %v3732_v10 = vand.u32 4294901760, %v1501_v63  ;;  %v3806_v4 = vsub.f32 %v1499_v23, %v3775_v21  ;;  %v1636_v20 = vsub.f32 %v3773_v48, %v4299_v62 }
  0xdd   :  { %1517 = vmatpush.msra.mxu0 %v3609_v39  ;;  %1661 = vmatpush.msra.mxu2 %v3613_v9 }
  0xde   :  { %1566 = vmatpush.msra.mxu1 %v1565_v13  ;;  %1707 = vmatpush.msra.mxu3 %v3563_v46  ;;  %4297 = vst [vmem:[#allocation12_spill] sm:$0xff] %v3732_v10  ;;  %v1589_v13 = vand.u32 4294901760, %v1588_v50  ;;  %v4209_v50 = vand.u32 4294901760, %v3725_v29  ;;  %v3765_v28 = vsub.f32 %v1501_v63, %v3732_v10  ;;  %v3782_v63 = vand.u32 4294901760, %v1498_v55 }
  0xdf   :  { %1519 = vmatpush.msra.mxu0 %v3620_v52  ;;  %1664 = vmatpush.msra.mxu2 %v3629_v56 }
  0xe0   :  { %1572 = vmatpush.msra.mxu1 %v1571_v45  ;;  %1709 = vmatpush.msra.mxu3 %v3577_v34  ;;  %v3742_v45 = vsub.f32 %v1472_v30, %v3704_v41  ;;  %v3755_v30 = vsub.f32 %v1471_v44, %v3721_v61  ;;  %v1612_v44 = vsub.f32 %v3707_v8, %v4205_v25  ;;  %v4298_v47 = vand.u32 4294901760, %v3765_v28 }
  0xe1   :  { %1521 = vmatpush.msra.mxu0 %v3633_v31  ;;  %1667 = vmatpush.msra.mxu2 %v3645_v59  ;;  %v1618_v42 = vsub.f32 %v3725_v29, %v4209_v50  ;;  %v3811_v2 = vsub.f32 %v1498_v55, %v3782_v63 }
  0xe2   :  { %1578 = vmatpush.msra.mxu1 %v1577_v16  ;;  %1711 = vmatpush.msra.mxu3 %v3593_v35  ;;  %v1606_v16 = vsub.f32 %v3692_v22, %v4202_v0  ;;  %v4212_v0 = vand.u32 4294901760, %v3742_v45  ;;  %v4214_v25 = vand.u32 4294901760, %v3755_v30 }
  0xe3   :  { %1523 = vmatpush.msra.mxu0 %v3661_v15  ;;  %1670 = vmatpush.msra.mxu2 %v3652_v1  ;;  %v608_v50 = vpop.f32.mrf.mxu0 }
  0xe4   :  { %1584 = vmatpush.msra.mxu1 %v1583_v36  ;;  %1713 = vmatpush.msra.mxu3 %v3609_v39  ;;  %v1601_v36 = vand.u32 4294901760, %v1600_v49  ;;  %v1497_v49 = vld [vmem:[%s4150_s5 + $0xd8] sm:$0xff]  ;;  %v1624_v38 = vsub.f32 %v3742_v45, %v4212_v0  ;;  %v1630_v23 = vsub.f32 %v3755_v30, %v4214_v25  ;;  %v609_v55 = vadd.f32 %v608_v50, %v3647_v18  ;;  %v1494_v25 = vld [vmem:[%s4150_s5 + $0xc0] sm:$0xff] }
  0xe5   :  { %1525 = vmatpush.msra.mxu0 %v3676_v37  ;;  %1673 = vmatpush.msra.mxu2 %v3667_v7  ;;  %v3795_v32 = vand.u32 4294901760, %v1497_v49  ;;  %v4301_v50 = vand.u32 4294901760, %v3790_v33 }
  0xe6   :  { %1590 = vmatpush.msra.mxu1 %v1589_v13  ;;  %1715 = vmatpush.msra.mxu3 %v3620_v52  ;;  %v1607_v13 = vand.u32 4294901760, %v1606_v16  ;;  %v1613_v16 = vand.u32 4294901760, %v1612_v44  ;;  %v1619_v44 = vand.u32 4294901760, %v1618_v42  ;;  %v1625_v0 = vand.u32 4294901760, %v1624_v38  ;;  %v1493_v38 = vld [vmem:[%s4150_s5 + $0xb8] sm:$0xff] }
  0xe7   :  { %1527 = vmatpush.msra.mxu0 %v3689_v26  ;;  %1676 = vmatpush.msra.mxu2 %v3692_v22  ;;  %v3830_v42 = vsub.f32 %v1497_v49, %v3795_v32  ;;  %v4300_v49 = vand.u32 4294901760, %v3531_v43  ;;  %v1631_v62 = vand.u32 4294901760, %v1630_v23  ;;  %v1893_v19 = vsub.f32 %v3790_v33, %v4301_v50  ;;  %v1492_v23 = vld [vmem:[%s4150_s5 + $0xb0] sm:$0xff] }
  0xe8   :  { %1596 = vmatpush.msra.mxu1 %v1595_v57  ;;  %1717 = vmatpush.msra.mxu3 %v3633_v31  ;;  %v1496_v57 = vld [vmem:[%s4150_s5 + $0xd0] sm:$0xff]  ;;  %v4303_v50 = vand.u32 4294901760, %v3806_v4 }
  0xe9   :  { %1529 = vmatpush.msra.mxu0 %v3704_v41  ;;  %1679 = vmatpush.msra.mxu2 %v3707_v8  ;;  %v3821_v58 = vand.u32 4294901760, %v1496_v57 }
  0xea   :  { %1602 = vmatpush.msra.mxu1 %v1601_v36  ;;  %1719 = vmatpush.msra.mxu3 %v3661_v15  ;;  %v1495_v36 = vld [vmem:[%s4150_s5 + $0xc8] sm:$0xff] }
  0xeb   :  { %1531 = vmatpush.msra.mxu0 %v3721_v61  ;;  %1682 = vmatpush.msra.mxu2 %v3725_v29  ;;  %v3854_v43 = vsub.f32 %v1496_v57, %v3821_v58  ;;  %v1637_v57 = vand.u32 4294901760, %v1636_v20  ;;  %v1491_v20 = vld [vmem:[%s4150_s5 + $0xa8] sm:$0xff] }
  0xec   :  { %1608 = vmatpush.msra.mxu1 %v1607_v13  ;;  %1721 = vmatpush.msra.mxu3 %v3676_v37  ;;  %v1887_v13 = vsub.f32 %v3765_v28, %v4298_v47  ;;  %v3840_v47 = vand.u32 4294901760, %v1495_v36 }
  0xed   :  { %1533 = vmatpush.msra.mxu0 %v3738_v24  ;;  %1685 = vmatpush.msra.mxu2 %v3742_v45  ;;  %v647_v18 = vpop.f32.mrf.mxu1  ;;  %v716_v53 = vpop.f32.mrf.mxu2 }
  0xee   :  { %1614 = vmatpush.msra.mxu1 %v1613_v16  ;;  %1723 = vmatpush.msra.mxu3 %v3689_v26  ;;  %v648_v14 = vadd.f32 %v647_v18, %v609_v55  ;;  %v4302_v55 = vand.u32 4294901760, %v3544_v5  ;;  %v1888_v18 = vand.u32 4294901760, %v1887_v13  ;;  %v1899_v5 = vsub.f32 %v3806_v4, %v4303_v50  ;;  %v1489_v50 = vld [vmem:[%s4150_s5 + $0x98] sm:$0xff] }
  0xef   :  { %1740 = vmatpush.msrb.mxu0 %v4300_v49  ;;  %1688 = vmatpush.msra.mxu2 %v3755_v30  ;;  %v3856_v49 = vand.u32 4294901760, %v1494_v25  ;;  %v3872_v13 = vand.u32 4294901760, %v1493_v38 }
  0xf0   :  { %1620 = vmatpush.msra.mxu1 %v1619_v44  ;;  %1725 = vmatpush.msra.mxu3 %v3704_v41  ;;  %v717_v16 = vadd.f32 %v716_v53, %v648_v14  ;;  %v753_v44 = vpop.f32.mrf.mxu3  ;;  %v4304_v14 = vand.u32 4294901760, %v3566_v27  ;;  %v4305_v53 = vand.u32 4294901760, %v3811_v2 }
  0xf1   :  { %1744 = vmatpush.msrb.mxu0 %v4302_v55  ;;  %1691 = vmatpush.msra.mxu2 %v3773_v48  ;;  %v3870_v55 = vsub.f32 %v1495_v36, %v3840_v47  ;;  %v1894_v36 = vand.u32 4294901760, %v1893_v19  ;;  %v3888_v27 = vsub.f32 %v1494_v25, %v3856_v49  ;;  %v1490_v19 = vld [vmem:[%s4150_s5 + $0xa0] sm:$0xff] }
  0xf2   :  { %1626 = vmatpush.msra.mxu1 %v1625_v0  ;;  %1727 = vmatpush.msra.mxu3 %v3721_v61  ;;  %v1905_v0 = vsub.f32 %v3811_v2, %v4305_v53  ;;  %v3880_v41 = vadd.f32 %v753_v44, %v717_v16  ;;  %v4307_v16 = vand.u32 4294901760, %v3830_v42  ;;  %v3903_v53 = vsub.f32 %v1493_v38, %v3872_v13 }
  0xf3   :  { %1748 = vmatpush.msrb.mxu0 %v4304_v14  ;;  %1844 = vmatpush.msrb.mxu2 %v3732_v10  ;;  %v3890_v14 = vand.u32 4294901760, %v1492_v23  ;;  %v4306_v10 = vand.u32 4294901760, %v3580_v3  ;;  %v1922_v25 = vand.u32 4294901760, %v3870_v55  ;;  %v3905_v3 = vand.u32 4294901760, %v1491_v20 }
  0xf4   :  { %1632 = vmatpush.msra.mxu1 %v1631_v62  ;;  %1729 = vmatpush.msra.mxu3 %v3738_v24  ;;  %v1911_v44 = vsub.f32 %v3830_v42, %v4307_v16  ;;  %v1900_v62 = vand.u32 4294901760, %v1899_v5  ;;  %v1906_v16 = vand.u32 4294901760, %v1905_v0 }
  0xf5   :  { %1752 = vmatpush.msrb.mxu0 %v4306_v10  ;;  %1846 = vmatpush.msrb.mxu2 %v3757_v60  ;;  %v4308_v10 = vand.u32 4294901760, %v3597_v40  ;;  %v3919_v5 = vsub.f32 %v1492_v23, %v3890_v14  ;;  %v3921_v40 = vand.u32 4294901760, %v1490_v19  ;;  %v3932_v23 = vsub.f32 %v1491_v20, %v3905_v3 }
  0xf6   :  { %1889 = vmatpush.msrb.mxu3 %v1888_v18  ;;  %1638 = vmatpush.msra.mxu1 %v1637_v57  ;;  %v4309_v18 = vand.u32 4294901760, %v3854_v43  ;;  %v4225_v57 = vand.u32 4294901760, %v3888_v27  ;;  %v1912_v0 = vand.u32 4294901760, %v1911_v44 }
  0xf7   :  { %1756 = vmatpush.msrb.mxu0 %v4308_v10  ;;  %1848 = vmatpush.msrb.mxu2 %v3775_v21  ;;  %v1934_v10 = vand.u32 4294901760, %v3903_v53 }
  0xf8   :  { %1807 = vmatpush.msrb.mxu1 %v3513_v11  ;;  %1895 = vmatpush.msrb.mxu3 %v1894_v36  ;;  %v1917_v38 = vsub.f32 %v3854_v43, %v4309_v18  ;;  %v4310_v11 = vand.u32 4294901760, %v3613_v9  ;;  %v1923_v36 = vsub.f32 %v3870_v55, %v1922_v25  ;;  %v3934_v18 = vand.u32 4294901760, %v1489_v50  ;;  %v1488_v9 = vld [vmem:[%s4150_s5 + $0x90] sm:$0xff] }
  0xf9   :  { %1850 = vmatpush.msrb.mxu2 %v3782_v63  ;;  %v1929_v20 = vsub.f32 %v3888_v27, %v4225_v57  ;;  %1539 = vmatmul.f32.vlgmr.msra.gmra.mxu0 %v3421_v17  ;;  %v4323_v17 = vand.u32 4294901760, %v3765_v28 }
  0xfa   :  { %1760 = vmatpush.msrb.mxu0 %v4310_v11  ;;  %1809 = vmatpush.msrb.mxu1 %v3520_v51  ;;  %v4311_v51 = vand.u32 4294901760, %v3629_v56  ;;  %v1918_v44 = vand.u32 4294901760, %v1917_v38  ;;  %v3948_v11 = vsub.f32 %v1490_v19, %v3921_v40  ;;  %v1487_v56 = vld [vmem:[%s4150_s5 + $0x88] sm:$0xff]  ;;  %v1935_v19 = vsub.f32 %v3903_v53, %v1934_v10 }
  0xfb   :  { %1901 = vmatpush.msrb.mxu3 %v1900_v62  ;;  %1852 = vmatpush.msrb.mxu2 %v3795_v32  ;;  %v4226_v62 = vand.u32 4294901760, %v3919_v5  ;;  %v1946_v38 = vand.u32 4294901760, %v3932_v23  ;;  %v3964_v57 = vsub.f32 %v1489_v50, %v3934_v18 }
  0xfc   :  { %1764 = vmatpush.msrb.mxu0 %v4311_v51  ;;  %1811 = vmatpush.msrb.mxu1 %v3539_v54  ;;  %v4312_v51 = vand.u32 4294901760, %v3645_v59  ;;  %v3956_v54 = vand.u32 4294901760, %v1488_v9  ;;  %v4313_v59 = vand.u32 4294901760, %v3652_v1  ;;  %v4314_v1 = vand.u32 4294901760, %v3667_v7 }
  0xfd   :  { %1907 = vmatpush.msrb.mxu3 %v1906_v16  ;;  %1854 = vmatpush.msrb.mxu2 %v3821_v58  ;;  %v1924_v16 = vand.u32 4294901760, %v1923_v36  ;;  %v1930_v36 = vand.u32 4294901760, %v1929_v20  ;;  %v1941_v50 = vsub.f32 %v3919_v5, %v4226_v62  ;;  %v1958_v20 = vand.u32 4294901760, %v3964_v57 }
  0xfe   :  { %1768 = vmatpush.msrb.mxu0 %v4312_v51  ;;  %1813 = vmatpush.msrb.mxu1 %v3552_v12  ;;  %v3969_v12 = vand.u32 4294901760, %v1487_v56  ;;  %v1952_v51 = vand.u32 4294901760, %v3948_v11  ;;  %v4315_v7 = vand.u32 4294901760, %v3692_v22 }
  0xff   :  { %1913 = vmatpush.msrb.mxu3 %v1912_v0  ;;  %v1486_v0 = vld [vmem:[%s4150_s5 + $0x80] sm:$0xff]  ;;  %1856 = vmatpush.msrb.mxu2 %v3840_v47 }
 0x100   :  { %1772 = vmatpush.msrb.mxu0 %v4313_v59  ;;  %1815 = vmatpush.msrb.mxu1 %v3563_v46  ;;  %v3983_v46 = vsub.f32 %v1488_v9, %v3956_v54  ;;  %v1936_v59 = vand.u32 4294901760, %v1935_v19  ;;  %v3990_v62 = vand.u32 4294901760, %v1486_v0  ;;  %v1942_v9 = vand.u32 4294901760, %v1941_v50 }
 0x101   :  { %1919 = vmatpush.msrb.mxu3 %v1918_v44  ;;  %1858 = vmatpush.msrb.mxu2 %v3856_v49  ;;  %v1947_v44 = vsub.f32 %v3932_v23, %v1946_v38  ;;  %v4316_v19 = vand.u32 4294901760, %v3707_v8  ;;  %v4317_v50 = vand.u32 4294901760, %v3725_v29 }
 0x102   :  { %1776 = vmatpush.msrb.mxu0 %v4314_v1  ;;  %1817 = vmatpush.msrb.mxu1 %v3577_v34  ;;  %v3996_v34 = vsub.f32 %v1487_v56, %v3969_v12  ;;  %v1964_v22 = vand.u32 4294901760, %v3983_v46  ;;  %v1959_v56 = vsub.f32 %v3964_v57, %v1958_v20  ;;  %v4318_v1 = vand.u32 4294901760, %v3742_v45 }
 0x103   :  { %1925 = vmatpush.msrb.mxu3 %v1924_v16  ;;  %1860 = vmatpush.msrb.mxu2 %v3872_v13  ;;  %v1953_v16 = vsub.f32 %v3948_v11, %v1952_v51 }
 0x104   :  { %1780 = vmatpush.msrb.mxu0 %v4315_v7  ;;  %1819 = vmatpush.msrb.mxu1 %v3593_v35  ;;  %v1948_v35 = vand.u32 4294901760, %v1947_v44  ;;  %v1960_v29 = vand.u32 4294901760, %v1959_v56  ;;  %v4322_v7 = vld [vmem:[#allocation6_spill] sm:$0xff] }
 0x105   :  { %1931 = vmatpush.msrb.mxu3 %v1930_v36  ;;  %1862 = vmatpush.msrb.mxu2 %v3890_v14  ;;  %v4011_v36 = vsub.f32 %v1486_v0, %v3990_v62  ;;  %v1954_v8 = vand.u32 4294901760, %v1953_v16  ;;  %v1965_v0 = vsub.f32 %v3983_v46, %v1964_v22 }
 0x106   :  { %1784 = vmatpush.msrb.mxu0 %v4316_v19  ;;  %1821 = vmatpush.msrb.mxu1 %v3609_v39  ;;  %v1970_v39 = vand.u32 4294901760, %v3996_v34 }
 0x107   :  { %1937 = vmatpush.msrb.mxu3 %v1936_v59  ;;  %1864 = vmatpush.msrb.mxu2 %v3905_v3  ;;  %v4319_v59 = vand.u32 4294901760, %v3755_v30  ;;  %v1966_v44 = vand.u32 4294901760, %v1965_v0 }
 0x108   :  { %1788 = vmatpush.msrb.mxu0 %v4317_v50  ;;  %1823 = vmatpush.msrb.mxu1 %v3620_v52  ;;  %v1976_v52 = vand.u32 4294901760, %v4011_v36  ;;  %v1971_v45 = vsub.f32 %v3996_v34, %v1970_v39 }
 0x109   :  { %1943 = vmatpush.msrb.mxu3 %v1942_v9  ;;  %1866 = vmatpush.msrb.mxu2 %v3921_v40  ;;  %v4326_v9 = vld [vmem:[#allocation12_spill] sm:$0xff] }
 0x10a   :  { %1792 = vmatpush.msrb.mxu0 %v4318_v1  ;;  %1825 = vmatpush.msrb.mxu1 %v3633_v31  ;;  %v4320_v31 = vand.u32 4294901760, %v3773_v48  ;;  %v1972_v30 = vand.u32 4294901760, %v1971_v45  ;;  %v4321_v48 = vld [vmem:[#allocation11_spill] sm:$0xff] }
 0x10b   :  { %1949 = vmatpush.msrb.mxu3 %v1948_v35  ;;  %1868 = vmatpush.msrb.mxu2 %v3934_v18 }
 0x10c   :  { %1796 = vmatpush.msrb.mxu0 %v4319_v59  ;;  %1827 = vmatpush.msrb.mxu1 %v3661_v15  ;;  %v1977_v15 = vsub.f32 %v4011_v36, %v1976_v52 }
 0x10d   :  { %1955 = vmatpush.msrb.mxu3 %v1954_v8  ;;  %1870 = vmatpush.msrb.mxu2 %v3956_v54 }
 0x10e   :  { %1800 = vmatpush.msrb.mxu0 %v4320_v31  ;;  %1829 = vmatpush.msrb.mxu1 %v3676_v37  ;;  %v1978_v37 = vand.u32 4294901760, %v1977_v15 }
 0x10f   :  { %1961 = vmatpush.msrb.mxu3 %v1960_v29  ;;  %1872 = vmatpush.msrb.mxu2 %v3969_v12 }
 0x110   :  { %1831 = vmatpush.msrb.mxu1 %v3689_v26  ;;  %1987 = vmatpush.msra.mxu0 %v3765_v28  ;;  %v4324_v26 = vld [vmem:[#allocation5_spill] sm:$0xff]  ;;  %v4327_v28 = vand.u32 4294901760, %v3806_v4 }
 0x111   :  { %1967 = vmatpush.msrb.mxu3 %v1966_v44  ;;  %1694 = vmatmul.f32.vlgmr.msra.gmra.mxu2 %v3351_v6  ;;  %v4325_v6 = vand.u32 4294901760, %v3790_v33 }
 0x112   :  { %1990 = vmatpush.msra.mxu0 %v3790_v33  ;;  %1833 = vmatpush.msrb.mxu1 %v4321_v48  ;;  %v4329_v33 = vand.u32 4294901760, %v3811_v2 }
 0x113   :  { %1874 = vmatpush.msrb.mxu2 %v3990_v62  ;;  %1973 = vmatpush.msrb.mxu3 %v1972_v30 }
 0x114   :  { %1733 = vmatmul.f32.vlgmr.msra.gmra.mxu3 %v4322_v7  ;;  %1993 = vmatpush.msra.mxu0 %v3806_v4  ;;  %v4331_v4 = vand.u32 4294901760, %v3830_v42 }
 0x115   :  { %2081 = vmatpush.msra.mxu2 %v4323_v17  ;;  %1835 = vmatpush.msrb.mxu1 %v3721_v61  ;;  %v4328_v61 = vld [vmem:[#allocation10_spill] sm:$0xff] }
 0x116   :  { %1979 = vmatpush.msrb.mxu3 %v1978_v37  ;;  %1640 = vmatmul.f32.vlgmr.msra.gmra.mxu1 %v4324_v26 }
 0x117   :  { %1996 = vmatpush.msra.mxu0 %v3811_v2  ;;  %2085 = vmatpush.msra.mxu2 %v4325_v6  ;;  %v4332_v2 = vand.u32 4294901760, %v3854_v43 }
 0x118   :  { %2148 = vmatpush.msra.mxu3 %v4326_v9  ;;  %1837 = vmatpush.msrb.mxu1 %v3738_v24  ;;  %v4330_v24 = vld [vmem:[#allocation8_spill] sm:$0xff] }
 0x119   :  { %1999 = vmatpush.msra.mxu0 %v3830_v42  ;;  %2089 = vmatpush.msra.mxu2 %v4327_v28 }
 0x11a   :  { %2040 = vmatpush.msra.mxu1 %v4326_v9  ;;  %2150 = vmatpush.msra.mxu3 %v3757_v60 }
 0x11b   :  { %1880 = vmatmul.f32.vlgmr.msrb.gmra.mxu2 %v4328_v61  ;;  %2002 = vmatpush.msra.mxu0 %v3854_v43 }
 0x11c   :  { %2042 = vmatpush.msra.mxu1 %v3757_v60  ;;  %2093 = vmatpush.msra.mxu2 %v4329_v33  ;;  %v4336_v60 = vld [vmem:[#allocation9_spill] sm:$0xff] }
 0x11d   :  { %2152 = vmatpush.msra.mxu3 %v3775_v21  ;;  %1802 = vmatmul.f32.vlgmr.msrb.gmra.mxu0 %v4324_v26 }
 0x11e   :  { %1981 = vmatmul.f32.vlgmr.msrb.gmra.mxu3 %v4330_v24  ;;  %2005 = vmatpush.msra.mxu0 %v3870_v55 }
 0x11f   :  { %2044 = vmatpush.msra.mxu1 %v3775_v21  ;;  %2097 = vmatpush.msra.mxu2 %v4331_v4  ;;  %v4333_v21 = vand.u32 4294901760, %v3888_v27 }
 0x120   :  { %2154 = vmatpush.msra.mxu3 %v3782_v63  ;;  %1839 = vmatmul.f32.vlgmr.msrb.gmra.mxu1 %v4324_v26 }
 0x121   :  { %2008 = vmatpush.msra.mxu0 %v3888_v27  ;;  %2046 = vmatpush.msra.mxu1 %v3782_v63 }
 0x122   :  { %2101 = vmatpush.msra.mxu2 %v4332_v2  ;;  %2156 = vmatpush.msra.mxu3 %v3795_v32 }
 0x123   :  { %2011 = vmatpush.msra.mxu0 %v3903_v53  ;;  %2048 = vmatpush.msra.mxu1 %v3795_v32  ;;  %v4335_v32 = vld [vmem:[#allocation7_spill] sm:$0xff] }
 0x124   :  { %2105 = vmatpush.msra.mxu2 %v1922_v25  ;;  %2158 = vmatpush.msra.mxu3 %v3821_v58 }
 0x125   :  { %2014 = vmatpush.msra.mxu0 %v3919_v5  ;;  %2050 = vmatpush.msra.mxu1 %v3821_v58  ;;  %v4334_v58 = vand.u32 4294901760, %v3919_v5 }
 0x126   :  { %2109 = vmatpush.msra.mxu2 %v4333_v21  ;;  %2160 = vmatpush.msra.mxu3 %v3840_v47  ;;  %v826_v42 = vpop.f32.mrf.mxu0 }
 0x127   :  { %2017 = vmatpush.msra.mxu0 %v3932_v23  ;;  %2052 = vmatpush.msra.mxu1 %v3840_v47 }
 0x128   :  { %2113 = vmatpush.msra.mxu2 %v1934_v10  ;;  %2162 = vmatpush.msra.mxu3 %v3856_v49 }
 0x129   :  { %2020 = vmatpush.msra.mxu0 %v3948_v11  ;;  %2054 = vmatpush.msra.mxu1 %v3856_v49 }
 0x12a   :  { %2117 = vmatpush.msra.mxu2 %v4334_v58  ;;  %2164 = vmatpush.msra.mxu3 %v3872_v13 }
 0x12b   :  { %2023 = vmatpush.msra.mxu0 %v3964_v57  ;;  %2056 = vmatpush.msra.mxu1 %v3872_v13 }
 0x12c   :  { %2121 = vmatpush.msra.mxu2 %v1946_v38  ;;  %2166 = vmatpush.msra.mxu3 %v3890_v14 }
 0x12d   :  { %2026 = vmatpush.msra.mxu0 %v3983_v46  ;;  %2058 = vmatpush.msra.mxu1 %v3890_v14  ;;  %v927_v63 = vpop.f32.mrf.mxu1 }
 0x12e   :  { %2125 = vmatpush.msra.mxu2 %v1952_v51  ;;  %2168 = vmatpush.msra.mxu3 %v3905_v3  ;;  %v981_v47 = vpop.f32.mrf.mxu2 }
 0x12f   :  { %2029 = vmatpush.msra.mxu0 %v3996_v34  ;;  %2060 = vmatpush.msra.mxu1 %v3905_v3  ;;  %v928_v3 = vadd.f32 %v927_v63, %v826_v42 }
 0x130   :  { %2129 = vmatpush.msra.mxu2 %v1958_v20  ;;  %2170 = vmatpush.msra.mxu3 %v3921_v40 }
 0x131   :  { %2032 = vmatpush.msra.mxu0 %v4011_v36  ;;  %2062 = vmatpush.msra.mxu1 %v3921_v40  ;;  %v1020_v43 = vpop.f32.mrf.mxu3  ;;  %v982_v40 = vadd.f32 %v981_v47, %v928_v3 }
 0x132   :  { %2133 = vmatpush.msra.mxu2 %v1964_v22  ;;  %2172 = vmatpush.msra.mxu3 %v3934_v18 }
 0x133   :  { %2035 = vmatmul.f32.vlgmr.msra.gmra.mxu0 %v4335_v32  ;;  %2064 = vmatpush.msra.mxu1 %v3934_v18 }
 0x134   :  { %2137 = vmatpush.msra.mxu2 %v1970_v39  ;;  %2174 = vmatpush.msra.mxu3 %v3956_v54  ;;  %v1089_v55 = vpop.f32.mrf.mxu0 }
 0x135   :  { %2066 = vmatpush.msra.mxu1 %v3956_v54 }
 0x136   :  { %2141 = vmatpush.msra.mxu2 %v1976_v52  ;;  %2176 = vmatpush.msra.mxu3 %v3969_v12 }
 0x137   :  { %2143 = vmatmul.f32.vlgmr.msra.gmra.mxu2 %v4330_v24  ;;  %2068 = vmatpush.msra.mxu1 %v3969_v12  ;;  %v1126_v49 = vpop.f32.mrf.mxu1 }
 0x138   :  { %2178 = vmatpush.msra.mxu3 %v3990_v62  ;;  %v1167_v13 = vpop.f32.mrf.mxu2 }
 0x139   :  { %2180 = vmatmul.f32.vlgmr.msra.gmra.mxu3 %v4330_v24  ;;  %2070 = vmatpush.msra.mxu1 %v3990_v62  ;;  %v1021_v62 = vadd.f32 %v1020_v43, %v982_v40 }
 0x13a   :  { %2074 = vmatmul.f32.vlgmr.msra.gmra.mxu1 %v4336_v60 }
 0x13b   :  { %v1268_v27 = vpop.f32.mrf.mxu3  ;;  %v1090_v38 = vadd.f32 %v1089_v55, %v1021_v62 }
 0x13d   :  { %v1127_v46 = vadd.f32 %v1126_v49, %v1090_v38 }
 0x13f   :  { %v1168_v16 = vadd.f32 %v1167_v13, %v1127_v46 }
 0x141   :  { %v1269_v35 = vadd.f32 %v1268_v27, %v1168_v16 }
 0x14a   :  { %v1322_v25 = vpop.f32.mrf.mxu0 }
 0x14b   :  { %v1323_v36 = vadd.f32 %v1322_v25, %v1269_v35 }
 0x154   :  { %v1361_v14 = vpop.f32.mrf.mxu1  ;;  %v1430_v53 = vpop.f32.mrf.mxu2 }
 0x155   :  { %v1362_v39 = vadd.f32 %v1361_v14, %v1323_v36  ;;  %v2216_v14 = vld [vmem:[%s4147_s2] sm:$0xff] }
 0x157   :  { %v1467_v57 = vpop.f32.mrf.mxu3  ;;  %v1431_v29 = vadd.f32 %v1430_v53, %v1362_v39 }
 0x159   :  { %v1468_v31 = vadd.f32 %v1467_v57, %v1431_v29 }
 0x15b   :  { %v2184_v48 = vmul.f32 %v1468_v31, %v1468_v31 }
 0x176   :  { %v1540_v10 = vpop.f32.mrf.mxu0 }
 0x193   :  { %v1641_v5 = vpop.f32.mrf.mxu1 }
 0x194   :  { %v1642_v23 = vadd.f32 %v1641_v5, %v1540_v10  ;;  %v1695_v18 = vpop.f32.mrf.mxu2 }
 0x196   :  { %v1696_v11 = vadd.f32 %v1695_v18, %v1642_v23 }
 0x197   :  { %v1734_v54 = vpop.f32.mrf.mxu3 }
 0x198   :  { %v1735_v12 = vadd.f32 %v1734_v54, %v1696_v11 }
 0x19a   :  { %v1803_v51 = vpop.f32.mrf.mxu0 }
 0x19b   :  { %v1804_v20 = vadd.f32 %v1803_v51, %v1735_v12 }
 0x19d   :  { %v1840_v34 = vpop.f32.mrf.mxu1 }
 0x19e   :  { %v1841_v19 = vadd.f32 %v1840_v34, %v1804_v20  ;;  %v1881_v22 = vpop.f32.mrf.mxu2 }
 0x1a0   :  { %v1882_v56 = vadd.f32 %v1881_v22, %v1841_v19 }
 0x1a1   :  { %v1982_v50 = vpop.f32.mrf.mxu3 }
 0x1a2   :  { %v1983_v1 = vadd.f32 %v1982_v50, %v1882_v56 }
 0x1b0   :  { %v2036_v8 = vpop.f32.mrf.mxu0 }
 0x1b1   :  { %v2037_v0 = vadd.f32 %v2036_v8, %v1983_v1 }
 0x1b7   :  { %v2075_v52 = vpop.f32.mrf.mxu1 }
 0x1b8   :  { %v2076_v59 = vadd.f32 %v2075_v52, %v2037_v0 }
 0x1ba   :  { %v2144_v45 = vpop.f32.mrf.mxu2 }
 0x1bb   :  { %v2145_v44 = vadd.f32 %v2144_v45, %v2076_v59 }
 0x1bc   :  { %v2181_v15 = vpop.f32.mrf.mxu3 }
 0x1bd   :  { %v2182_v30 = vadd.f32 %v2181_v15, %v2145_v44 }
 0x1bf   :  { %v2185_v37 = vmul.f32 %v2182_v30, %v2182_v30 }
 0x1c1   :  { %v2186_v7 = vadd.f32 %v2185_v37, %v2184_v48 }
 0x1c3   :  { %2239 = vrsqrt.f32 %v2186_v7  ;;  %vm2194_vm2 = vcmp.eq.f32.partialorder %v2186_v7, inf  ;;  %v2197_v24 = vand.u32 2147483648, %v2186_v7  ;;  %vm2196_vm3 = vcmp.eq.f32.partialorder %v2186_v7, 0.0 }
 0x1c9   :  { %v2240_v17 = vpop.eup %2239 }
 0x1ca   :  { %v2188_v26 = vmul.f32 %v2240_v17, %v2186_v7 }
 0x1cc   :  { %v2189_v6 = vmul.f32 %v2240_v17, %v2188_v26 }
 0x1ce   :  { %v2190_v9 = vmul.f32 0.5, %v2189_v6 }
 0x1d0   :  { %v2191_v28 = vsub.f32 1.5, %v2190_v9 }
 0x1d2   :  { %v2192_v61 = vmul.f32 %v2240_v17, %v2191_v28 }
 0x1d4   :  { %v2193_v33 = vmul.f32 %v2192_v61, %v2186_v7 }
 0x1d6   :  { %v2195_v4 = vsel %vm2194_vm2, %v2186_v7, %v2193_v33 }
 0x1d7   :  { %v2198_v2 = vsel %vm2196_vm3, %v2197_v24, %v2195_v4 }
 0x1d8   :  { %v2199_v21 = vmul.f32 4.0, %v2198_v2 }
 0x1da   :  { %v2200_v58 = vadd.f32 0.0001, %v2199_v21 }
 0x1dc   :  { %2241 = vrcp.f32 %v2200_v58  ;;  %v2212_v42 = vand.u32 2147483648, %v2200_v58  ;;  %v2210_v43 = vand.u32 2147483647, %v2200_v58  ;;  %vm2206_vm5 = vweird.f32 %v2200_v58 }
 0x1de   :  { %v2213_v55 = vor.u32 1.1754944e-38, %v2212_v42  ;;  %vm2211_vm7 = vcmp.eq.f32.partialorder %v2210_v43, 8.507059e+37 }
 0x1e2   :  { %v2242_v32 = vpop.eup %2241 }
 0x1e3   :  { %v2202_v60 = vmul.f32 %v2242_v32, %v2200_v58  ;;  %vm2207_vm4 = vweird.f32 %v2242_v32 }
 0x1e4   :  { %vm2208_vm6 = vmor %vm2206_vm5, %vm2207_vm4 }
 0x1e5   :  { %v2203_v63 = vsub.f32 1.0, %v2202_v60 }
 0x1e7   :  { %v2204_v47 = vmul.f32 %v2242_v32, %v2203_v63 }
 0x1e9   :  { %v2205_v49 = vadd.f32 %v2242_v32, %v2204_v47 }
 0x1eb   :  { %v2209_v13 = vsel %vm2208_vm6, %v2242_v32, %v2205_v49 }
 0x1ec   :  { %v2214_v27 = vsel %vm2211_vm7, %v2213_v55, %v2209_v13 }
 0x1ed   :  { %v2215_v25 = vmul.f32 %v2214_v27, %v3880_v41 }
 0x1ef   :  { %v2217_v53 = vmul.f32 %v2216_v14, %v2215_v25 }
 0x1f1   :  { %2219 = vst.msk [vmem:[#allocation2] sm:$0xff] %vm2218_vm8, %v2217_v53 }
 0x1f2   :  { %2230 = dma.vmem_to_hbm [thread:$0]  %s2226_s16, 128, %s2228_s19, [#allocation3]  }
 0x1f3   :  { %2268 = dma.done.wait [#allocation3], 128  }
 0x1f4   :  { %2269 = vsyncadd [#allocation3], 4294967168 }
 0x1f5   :  { %2235 = vsyncpa [#allocation3], 1 }

</bundles_post_ra>
